<compile_context>
chip_gen: v5e
topology: v5e:2x2
jax: 0.10.0
libtpu: 0.0.40
codegen_flags: <defaults>
</compile_context>

<pallas_src>
import jax
import jax.numpy as jnp
from jax.experimental import pallas as pl
from jax.experimental.pallas import tpu as pltpu


# ------------------------------ Pallas kernel --------------------------------

def _make_kernel(*, inv_scale, n_group_heads, head_dim, window, seq_len, q_tile):
    NEG = -1e30  # finite "masked" sentinel (torch uses -inf)
    G, hd, W, S, tq = n_group_heads, head_dim, window, seq_len, q_tile
    half = W // 2

    def kernel(value_ref, key_ref, query_ref, mask_ref,
               wv_ref, wk_ref, wq_ref, b_vkq_ref, wo_ref, bo_ref,
               out_ref, attn_ref):
        f32, bf16 = jnp.float32, jnp.bfloat16
        t = pl.program_id(1)          # query-tile index
        g = pl.program_id(2)          # head-group index (fc_out reduction axis)

        # ---- grouped projections: one (., E) @ (E, G*hd) MXU matmul each ----
        vh = jnp.dot(value_ref[0], wv_ref[0],
                     preferred_element_type=f32) + b_vkq_ref[0, 0]      # (S, D)
        kh = jnp.dot(key_ref[0], wk_ref[0],
                     preferred_element_type=f32) + b_vkq_ref[0, 1]      # (S, D)
        qh = (jnp.dot(query_ref[0], wq_ref[0],
                      preferred_element_type=f32) + b_vkq_ref[0, 2]) * inv_scale  # (tq, D)

        # ---- window + key-padding masks built in-kernel (no (S,S) HBM block) ----
        q0 = t * tq
        qi = q0 + jax.lax.broadcasted_iota(jnp.int32, (tq, S), 0)       # query index
        kj = jax.lax.broadcasted_iota(jnp.int32, (tq, S), 1)            # key index
        win = jnp.abs(kj - qi) <= half                                  # (tq, S) bool
        keep = jnp.logical_and(win, mask_ref[0] > 0.0)                  # in-window & kept
        fill = jnp.where(win, NEG, 0.0)   # in-window padded -> NEG; outside window -> 0

        # ---- per-head attention for the G heads of this group (unrolled) ----
        partial = None
        for gi in range(G):
            sl = slice(gi * hd, (gi + 1) * hd)
            s_g = jnp.einsum("qd,kd->qk",
                             qh[:, sl].astype(bf16), kh[:, sl].astype(bf16),
                             preferred_element_type=f32)                # (tq, S)
            # Fused select (no f32 mask multiply); zeros outside the window
            # join the softmax exactly as in the torch code.
            logits = jnp.where(keep, s_g, fill)                         # (tq, S) f32
            m = jnp.max(logits, axis=-1, keepdims=True)
            p = jnp.exp(logits - m)
            l = jnp.sum(p, axis=-1, keepdims=True)
            a = p * pl.reciprocal(l, approx=True)                       # (tq, S) f32

            attn_ref[0, gi] = a.astype(attn_ref.dtype)   # lane-dense (tq, S) store

            ctx_g = jnp.dot(a.astype(bf16), vh[:, sl].astype(bf16),
                            preferred_element_type=f32)                 # (tq, hd)
            contrib = jnp.dot(ctx_g.astype(bf16), wo_ref[0, sl],
                              preferred_element_type=f32)               # (tq, E)
            partial = contrib if partial is None else partial + contrib

        # ---- accumulate fc_out over the head-group grid axis (resident block) ----
        @pl.when(g == 0)
        def _():
            out_ref[0] = (partial + bo_ref[...]).astype(out_ref.dtype)

        @pl.when(g > 0)
        def _():
            out_ref[0] = out_ref[0] + partial.astype(out_ref.dtype)

    return kernel


# ------------------------------ wrapper ---------------------------------------

def windowed_self_attention(params, value, key, query, mask, *, heads, window_size,
                            q_tile=None, group_heads=None,
                            attn_dtype=jnp.bfloat16, vmem_limit_bytes=None):
    """Forward of WindowedSelfAttention. Returns (out, attention).

    value/key/query: (N, S, E) float32; mask broadcastable to (N, 1, 1, S)
    (1.0 = keep key, 0.0 = padding).  Attention map returned in `attn_dtype`
    (bf16 by default to halve the dominant HBM writeback).
    # TODO(synk): alibi_bias (forward default None) is not supported.
    """
    N, S, E = query.shape
    H = heads
    hd = E // H
    assert hd * H == E, "embed_size must be divisible by heads"
    assert key.shape == (N, S, E) and value.shape == (N, S, E)
    W = min(window_size, S)

    # Head grouping: G heads per grid step so the grouped matmuls see a wide
    # (>=256 lane) output / contraction dim when head_dim is small.
    if group_heads is None:
        group_heads = H
        for cand in range(1, H + 1):
            if H % cand == 0 and cand * hd >= 256:
                group_heads = cand
                break
    G = group_heads
    assert H % G == 0, "group_heads must divide heads"
    NG = H // G
    D = G * hd

    # Query tiling: caps the (tq, S) softmax working set per grid step.
    if q_tile is None:
        q_tile = min(S, 256)
    tq = q_tile
    assert S % tq == 0, "q_tile must divide the sequence length"
    n_qt = S // tq
    # TODO(synk): at realistic sizes pad S to a multiple of 128 and G*hd to a
    # lane multiple, and pass vmem_limit_bytes (~100 MiB v5e/v6e, <=56 MiB v7x).

    f32, bf16 = jnp.float32, jnp.bfloat16

    # ---- host-side weight packing: pre-transposed [in, out], group-sliced ----
    def pack_w(w):            # torch [out, in] -> (NG, E, D) so y_g = x @ w_g
        return w.T.reshape(E, NG, D).transpose(1, 0, 2).astype(bf16)

    def pack_b(b):
        return b.reshape(NG, 1, D)

    wv = pack_w(params["wv"])
    wk = pack_w(params["wk"])
    wq = pack_w(params["wq"])
    b_vkq = jnp.stack([pack_b(params["bv"]), pack_b(params["bk"]),
                       pack_b(params["bq"])], axis=1).astype(f32)       # (NG, 3, 1, D)
    w_out = params["wo"].T.reshape(NG, D, E).astype(bf16)               # (NG, D, E)
    b_out = params["bo"].reshape(1, E).astype(f32)                      # (1, E)

    mask_f = jnp.reshape(mask, (N, 1, S)).astype(f32)                   # (N, 1, S)

    kernel = _make_kernel(inv_scale=1.0 / (E ** 0.5), n_group_heads=G,
                          head_dim=hd, window=W, seq_len=S, q_tile=tq)

    in_specs = [
        pl.BlockSpec((1, S, E),    lambda n, t, g: (n, 0, 0)),      # value
        pl.BlockSpec((1, S, E),    lambda n, t, g: (n, 0, 0)),      # key
        pl.BlockSpec((1, tq, E),   lambda n, t, g: (n, t, 0)),      # query tile
        pl.BlockSpec((1, 1, S),    lambda n, t, g: (n, 0, 0)),      # key-padding mask
        pl.BlockSpec((1, E, D),    lambda n, t, g: (g, 0, 0)),      # wv (group g)
        pl.BlockSpec((1, E, D),    lambda n, t, g: (g, 0, 0)),      # wk (group g)
        pl.BlockSpec((1, E, D),    lambda n, t, g: (g, 0, 0)),      # wq (group g)
        pl.BlockSpec((1, 3, 1, D), lambda n, t, g: (g, 0, 0, 0)),   # v/k/q biases
        pl.BlockSpec((1, D, E),    lambda n, t, g: (g, 0, 0)),      # fc_out rows (group g)
        pl.BlockSpec((1, E),       lambda n, t, g: (0, 0)),         # fc_out bias
    ]
    out_specs = (
        pl.BlockSpec((1, tq, E),    lambda n, t, g: (n, t, 0)),     # out (accum over g)
        pl.BlockSpec((1, G, tq, S), lambda n, t, g: (n, g, t, 0)),  # attention maps
    )
    out_shape = (
        jax.ShapeDtypeStruct((N, S, E), f32),
        jax.ShapeDtypeStruct((N, H, S, S), attn_dtype),
    )

    cp_kwargs = dict(dimension_semantics=("parallel", "parallel", "arbitrary"))
    if vmem_limit_bytes is not None:
        cp_kwargs["vmem_limit_bytes"] = vmem_limit_bytes

    out, attn = pl.pallas_call(
        kernel,
        grid=(N, n_qt, NG),
        in_specs=in_specs,
        out_specs=out_specs,
        out_shape=out_shape,
        compiler_params=pltpu.CompilerParams(**cp_kwargs),
    )(value.astype(bf16), key.astype(bf16), query.astype(bf16), mask_f,
      wv, wk, wq, b_vkq, w_out, b_out)
    return out, attn


# ------------------------- pure-JAX reference ---------------------------------

def reference_forward(params, value, key, query, mask, *, heads, window_size):
    N, S, E = query.shape
    H, hd = heads, E // heads
    W = min(window_size, S)
    v = value @ params["wv"].T + params["bv"]
    k = key @ params["wk"].T + params["bk"]
    q = query @ params["wq"].T + params["bq"]
    v = v.reshape(N, S, H, hd)
    k = k.reshape(N, S, H, hd)
    q = q.reshape(N, S, H, hd)
    raw = jnp.einsum("nqhd,nkhd->nhqk", q, k)
    keep = jnp.reshape(mask, (N, 1, 1, S)) > 0
    qi = jnp.arange(S)[:, None]
    kj = jnp.arange(S)[None, :]
    win = (kj >= qi - W // 2) & (kj <= qi + W // 2)
    logits = jnp.where(win[None, None], jnp.where(keep, raw, -1e30), 0.0)
    logits = logits / (E ** 0.5)
    attn = jax.nn.softmax(logits, axis=-1)
    out = jnp.einsum("nhqk,nkhd->nqhd", attn, v).reshape(N, S, E)
    out = out @ params["wo"].T + params["bo"]
    return out, attn


def _linear_init(rng, fan_in, fan_out):
    kw, kb = jax.random.split(rng)
    bound = 1.0 / (fan_in ** 0.5)
    w = jax.random.uniform(kw, (fan_out, fan_in), jnp.float32, -bound, bound)
    b = jax.random.uniform(kb, (fan_out,), jnp.float32, -bound, bound)
    return w, b


# ------------------------------ demo / smoke test ------------------------------

if __name__ == "__main__":
    N, S, E, HEADS, WINDOW = 2, 32, 64, 8, 6

    root = jax.random.PRNGKey(0)
    rs = jax.random.split(root, 7)

    params = {}
    params["wv"], params["bv"] = _linear_init(rs[0], E, E)
    params["wk"], params["bk"] = _linear_init(rs[1], E, E)
    params["wq"], params["bq"] = _linear_init(rs[2], E, E)
    params["wo"], params["bo"] = _linear_init(rs[3], E, E)

    value = jax.random.normal(rs[4], (N, S, E), jnp.float32)
    key_t = jax.random.normal(rs[5], (N, S, E), jnp.float32)
    query = jax.random.normal(rs[6], (N, S, E), jnp.float32)

    mask = jnp.ones((N, 1, 1, S), jnp.float32)
    mask = mask.at[:, :, :, -4:].set(0.0)        # pad the last four keys
    mask = mask.at[1, :, :, S // 2].set(0.0)     # batch 1: also mask a mid-sequence key

    # q_tile=16 -> 2 query tiles; group_heads=4 -> 2 head groups (exercises both
    # the q-tiling offsets and the fc_out accumulation over head groups).
    out, attn = windowed_self_attention(
        params, value, key_t, query, mask,
        heads=HEADS, window_size=WINDOW, q_tile=16, group_heads=4)
    out = jax.block_until_ready(out)
    attn = jax.block_until_ready(attn)

    assert out.shape == (N, S, E)
    assert attn.shape == (N, HEADS, S, S)
    assert bool(jnp.all(jnp.isfinite(out)))
    assert bool(jnp.all(jnp.isfinite(attn.astype(jnp.float32))))

    ref_out, ref_attn = reference_forward(
        params, value, key_t, query, mask, heads=HEADS, window_size=WINDOW)
    assert bool(jnp.allclose(attn.astype(jnp.float32), ref_attn, atol=5e-2, rtol=5e-2))
    assert bool(jnp.allclose(out, ref_out, atol=5e-2, rtol=5e-2))

    print("KERNEL_OK")
</pallas_src>

<mosaic_0001>
module attributes {stable_mosaic.version = 11 : i64} {
  func.func @kernel(%arg0: i32, %arg1: i32, %arg2: i32, %arg3: memref<1x32x64xbf16, #tpu.memory_space<vmem>>, %arg4: memref<1x32x64xbf16, #tpu.memory_space<vmem>>, %arg5: memref<1x16x64xbf16, #tpu.memory_space<vmem>>, %arg6: memref<1x1x32xf32, #tpu.memory_space<vmem>>, %arg7: memref<1x64x32xbf16, #tpu.memory_space<vmem>>, %arg8: memref<1x64x32xbf16, #tpu.memory_space<vmem>>, %arg9: memref<1x64x32xbf16, #tpu.memory_space<vmem>>, %arg10: memref<1x3x1x32xf32, #tpu.memory_space<vmem>>, %arg11: memref<1x32x64xbf16, #tpu.memory_space<vmem>>, %arg12: memref<1x64xf32, #tpu.memory_space<vmem>>, %arg13: memref<1x16x64xf32, #tpu.memory_space<vmem>>, %arg14: memref<1x4x16x32xbf16, #tpu.memory_space<vmem>>) attributes {dimension_semantics = [#tpu.dimension_semantics<parallel>, #tpu.dimension_semantics<parallel>, #tpu.dimension_semantics<arbitrary>], iteration_bounds = array<i64: 2, 2, 2>, scalar_prefetch = 0 : i64, scratch_operands = 0 : i64, tpu.core_type = #tpu.core_type<tc>, window_params = [{transform_indices = @transform_0, window_bounds = array<i64: 1, 32, 64>}, {transform_indices = @transform_1, window_bounds = array<i64: 1, 32, 64>}, {transform_indices = @transform_2, window_bounds = array<i64: 1, 16, 64>}, {transform_indices = @transform_3, window_bounds = array<i64: 1, 1, 32>}, {transform_indices = @transform_4, window_bounds = array<i64: 1, 64, 32>}, {transform_indices = @transform_5, window_bounds = array<i64: 1, 64, 32>}, {transform_indices = @transform_6, window_bounds = array<i64: 1, 64, 32>}, {transform_indices = @transform_7, window_bounds = array<i64: 1, 3, 1, 32>}, {transform_indices = @transform_8, window_bounds = array<i64: 1, 32, 64>}, {pipeline_mode = #tpu.pipeline_mode<synchronous>, transform_indices = @transform_9, window_bounds = array<i64: 1, 64>}, {transform_indices = @transform_10, window_bounds = array<i64: 1, 16, 64>}, {transform_indices = @transform_11, window_bounds = array<i64: 1, 4, 16, 32>}]} {
    %c0 = arith.constant 0 : index
    %c0_0 = arith.constant 0 : index
    %c0_1 = arith.constant 0 : index
    %0 = vector.load %arg3[%c0, %c0_0, %c0_1] : memref<1x32x64xbf16, #tpu.memory_space<vmem>>, vector<1x32x64xbf16>
    %1 = vector.shape_cast %0 : vector<1x32x64xbf16> to vector<32x64xbf16>
    %c0_2 = arith.constant 0 : index
    %c0_3 = arith.constant 0 : index
    %c0_4 = arith.constant 0 : index
    %2 = vector.load %arg7[%c0_2, %c0_3, %c0_4] : memref<1x64x32xbf16, #tpu.memory_space<vmem>>, vector<1x64x32xbf16>
    %3 = vector.shape_cast %2 : vector<1x64x32xbf16> to vector<64x32xbf16>
    %cst = arith.constant dense<0.000000e+00> : vector<32x32xf32>
    %4 = tpu.matmul %1, %3, %cst {dimension_numbers = #tpu.dot_dimension_numbers<[1], [0], [0], [1], [0, 0, 1, 1], [], []>} : vector<32x64xbf16>, vector<64x32xbf16>, vector<32x32xf32> -> vector<32x32xf32>
    %c0_5 = arith.constant 0 : index
    %c0_6 = arith.constant 0 : index
    %c0_7 = arith.constant 0 : index
    %c0_8 = arith.constant 0 : index
    %5 = vector.load %arg10[%c0_5, %c0_6, %c0_7, %c0_8] : memref<1x3x1x32xf32, #tpu.memory_space<vmem>>, vector<1x1x1x32xf32>
    %6 = vector.shape_cast %5 : vector<1x1x1x32xf32> to vector<1x32xf32>
    %7 = vector.broadcast %6 : vector<1x32xf32> to vector<32x32xf32>
    %8 = arith.addf %4, %7 : vector<32x32xf32>
    %c0_9 = arith.constant 0 : index
    %c0_10 = arith.constant 0 : index
    %c0_11 = arith.constant 0 : index
    %9 = vector.load %arg4[%c0_9, %c0_10, %c0_11] : memref<1x32x64xbf16, #tpu.memory_space<vmem>>, vector<1x32x64xbf16>
    %10 = vector.shape_cast %9 : vector<1x32x64xbf16> to vector<32x64xbf16>
    %c0_12 = arith.constant 0 : index
    %c0_13 = arith.constant 0 : index
    %c0_14 = arith.constant 0 : index
    %11 = vector.load %arg8[%c0_12, %c0_13, %c0_14] : memref<1x64x32xbf16, #tpu.memory_space<vmem>>, vector<1x64x32xbf16>
    %12 = vector.shape_cast %11 : vector<1x64x32xbf16> to vector<64x32xbf16>
    %cst_15 = arith.constant dense<0.000000e+00> : vector<32x32xf32>
    %13 = tpu.matmul %10, %12, %cst_15 {dimension_numbers = #tpu.dot_dimension_numbers<[1], [0], [0], [1], [0, 0, 1, 1], [], []>} : vector<32x64xbf16>, vector<64x32xbf16>, vector<32x32xf32> -> vector<32x32xf32>
    %c0_16 = arith.constant 0 : index
    %c1 = arith.constant 1 : index
    %c0_17 = arith.constant 0 : index
    %c0_18 = arith.constant 0 : index
    %14 = vector.load %arg10[%c0_16, %c1, %c0_17, %c0_18] : memref<1x3x1x32xf32, #tpu.memory_space<vmem>>, vector<1x1x1x32xf32>
    %15 = vector.shape_cast %14 : vector<1x1x1x32xf32> to vector<1x32xf32>
    %16 = vector.broadcast %15 : vector<1x32xf32> to vector<32x32xf32>
    %17 = arith.addf %13, %16 : vector<32x32xf32>
    %c0_19 = arith.constant 0 : index
    %c0_20 = arith.constant 0 : index
    %c0_21 = arith.constant 0 : index
    %18 = vector.load %arg5[%c0_19, %c0_20, %c0_21] : memref<1x16x64xbf16, #tpu.memory_space<vmem>>, vector<1x16x64xbf16>
    %19 = vector.shape_cast %18 : vector<1x16x64xbf16> to vector<16x64xbf16>
    %c0_22 = arith.constant 0 : index
    %c0_23 = arith.constant 0 : index
    %c0_24 = arith.constant 0 : index
    %20 = vector.load %arg9[%c0_22, %c0_23, %c0_24] : memref<1x64x32xbf16, #tpu.memory_space<vmem>>, vector<1x64x32xbf16>
    %21 = vector.shape_cast %20 : vector<1x64x32xbf16> to vector<64x32xbf16>
    %cst_25 = arith.constant dense<0.000000e+00> : vector<16x32xf32>
    %22 = tpu.matmul %19, %21, %cst_25 {dimension_numbers = #tpu.dot_dimension_numbers<[1], [0], [0], [1], [0, 0, 1, 1], [], []>} : vector<16x64xbf16>, vector<64x32xbf16>, vector<16x32xf32> -> vector<16x32xf32>
    %c0_26 = arith.constant 0 : index
    %c2 = arith.constant 2 : index
    %c0_27 = arith.constant 0 : index
    %c0_28 = arith.constant 0 : index
    %23 = vector.load %arg10[%c0_26, %c2, %c0_27, %c0_28] : memref<1x3x1x32xf32, #tpu.memory_space<vmem>>, vector<1x1x1x32xf32>
    %24 = vector.shape_cast %23 : vector<1x1x1x32xf32> to vector<1x32xf32>
    %25 = vector.broadcast %24 : vector<1x32xf32> to vector<16x32xf32>
    %26 = arith.addf %22, %25 : vector<16x32xf32>
    %cst_29 = arith.constant 1.250000e-01 : f32
    %27 = vector.broadcast %cst_29 : f32 to vector<16x32xf32>
    %28 = arith.mulf %26, %27 : vector<16x32xf32>
    %c16_i32 = arith.constant 16 : i32
    %29 = arith.muli %arg1, %c16_i32 : i32
    %30 = tpu.iota {dimensions = array<i32: 0>} : vector<16x32xi32>
    %31 = vector.broadcast %29 : i32 to vector<16x32xi32>
    %32 = arith.addi %31, %30 : vector<16x32xi32>
    %33 = tpu.iota {dimensions = array<i32: 1>} : vector<16x32xi32>
    %34 = arith.subi %33, %32 : vector<16x32xi32>
    %35 = math.absi %34 : vector<16x32xi32>
    %c3_i32 = arith.constant 3 : i32
    %36 = vector.broadcast %c3_i32 : i32 to vector<16x32xi32>
    %37 = arith.cmpi sle, %35, %36 : vector<16x32xi32>
    %c0_30 = arith.constant 0 : index
    %c0_31 = arith.constant 0 : index
    %c0_32 = arith.constant 0 : index
    %38 = vector.load %arg6[%c0_30, %c0_31, %c0_32] : memref<1x1x32xf32, #tpu.memory_space<vmem>>, vector<1x1x32xf32>
    %39 = vector.shape_cast %38 : vector<1x1x32xf32> to vector<1x32xf32>
    %cst_33 = arith.constant 0.000000e+00 : f32
    %40 = vector.broadcast %cst_33 : f32 to vector<1x32xf32>
    %41 = arith.cmpf ogt, %39, %40 : vector<1x32xf32>
    %42 = vector.broadcast %41 : vector<1x32xi1> to vector<16x32xi1>
    %43 = arith.andi %37, %42 : vector<16x32xi1>
    %cst_34 = arith.constant -1.000000e+30 : f32
    %cst_35 = arith.constant 0.000000e+00 : f32
    %44 = vector.broadcast %cst_34 : f32 to vector<16x32xf32>
    %45 = vector.broadcast %cst_35 : f32 to vector<16x32xf32>
    %46 = arith.select %37, %44, %45 : vector<16x32xi1>, vector<16x32xf32>
    %47 = vector.extract_strided_slice %28 {offsets = [0, 0], sizes = [16, 8], strides = [1, 1]} : vector<16x32xf32> to vector<16x8xf32>
    %48 = arith.truncf %47 : vector<16x8xf32> to vector<16x8xbf16>
    %49 = vector.extract_strided_slice %17 {offsets = [0, 0], sizes = [32, 8], strides = [1, 1]} : vector<32x32xf32> to vector<32x8xf32>
    %50 = arith.truncf %49 : vector<32x8xf32> to vector<32x8xbf16>
    "tpu.trace_start"() <{level = 10 : i32, message = "qd,kd->qk"}> : () -> ()
    %cst_36 = arith.constant dense<0.000000e+00> : vector<16x32xf32>
    %51 = tpu.matmul %48, %50, %cst_36 {dimension_numbers = #tpu.dot_dimension_numbers<[1], [1], [0], [0], [0, 0, 1, 0], [], []>} : vector<16x8xbf16>, vector<32x8xbf16>, vector<16x32xf32> -> vector<16x32xf32>
    "tpu.trace_stop"() : () -> ()
    %52 = arith.select %43, %51, %46 : vector<16x32xi1>, vector<16x32xf32>
    %cst_37 = arith.constant dense<0xFF800000> : vector<16xf32>
    %53 = vector.multi_reduction <maximumf>, %52, %cst_37 [1] : vector<16x32xf32> to vector<16xf32>
    %54 = vector.shape_cast %53 : vector<16xf32> to vector<16x1xf32>
    %55 = vector.broadcast %54 : vector<16x1xf32> to vector<16x32xf32>
    %56 = arith.subf %52, %55 : vector<16x32xf32>
    %57 = math.exp %56 : vector<16x32xf32>
    %cst_38 = arith.constant dense<0.000000e+00> : vector<16xf32>
    %58 = vector.multi_reduction <add>, %57, %cst_38 [1] : vector<16x32xf32> to vector<16xf32>
    %59 = vector.shape_cast %58 : vector<16xf32> to vector<16x1xf32>
    %60 = tpu.reciprocal %59 {approx = true} : vector<16x1xf32> -> vector<16x1xf32>
    %61 = vector.broadcast %60 : vector<16x1xf32> to vector<16x32xf32>
    %62 = arith.mulf %57, %61 : vector<16x32xf32>
    %63 = arith.truncf %62 : vector<16x32xf32> to vector<16x32xbf16>
    %c0_39 = arith.constant 0 : index
    %c0_40 = arith.constant 0 : index
    %c0_41 = arith.constant 0 : index
    %c0_42 = arith.constant 0 : index
    %64 = vector.load %arg14[%c0_39, %c0_40, %c0_41, %c0_42] : memref<1x4x16x32xbf16, #tpu.memory_space<vmem>>, vector<1x1x16x32xbf16>
    %65 = vector.shape_cast %64 : vector<1x1x16x32xbf16> to vector<16x32xbf16>
    %66 = vector.shape_cast %63 : vector<16x32xbf16> to vector<1x1x16x32xbf16>
    tpu.vector_store %arg14[%c0_39, %c0_40, %c0_41, %c0_42], %66 {strides = array<i32>} : memref<1x4x16x32xbf16, #tpu.memory_space<vmem>>, vector<1x1x16x32xbf16>,
    %67 = arith.truncf %62 : vector<16x32xf32> to vector<16x32xbf16>
    %68 = vector.extract_strided_slice %8 {offsets = [0, 0], sizes = [32, 8], strides = [1, 1]} : vector<32x32xf32> to vector<32x8xf32>
    %69 = arith.truncf %68 : vector<32x8xf32> to vector<32x8xbf16>
    %cst_43 = arith.constant dense<0.000000e+00> : vector<16x8xf32>
    %70 = tpu.matmul %67, %69, %cst_43 {dimension_numbers = #tpu.dot_dimension_numbers<[1], [0], [0], [1], [0, 0, 1, 1], [], []>} : vector<16x32xbf16>, vector<32x8xbf16>, vector<16x8xf32> -> vector<16x8xf32>
    %71 = arith.truncf %70 : vector<16x8xf32> to vector<16x8xbf16>
    %c0_44 = arith.constant 0 : index
    %c0_45 = arith.constant 0 : index
    %c0_46 = arith.constant 0 : index
    %72 = vector.load %arg11[%c0_44, %c0_45, %c0_46] : memref<1x32x64xbf16, #tpu.memory_space<vmem>>, vector<1x8x64xbf16>
    %73 = vector.shape_cast %72 : vector<1x8x64xbf16> to vector<8x64xbf16>
    %cst_47 = arith.constant dense<0.000000e+00> : vector<16x64xf32>
    %74 = tpu.matmul %71, %73, %cst_47 {dimension_numbers = #tpu.dot_dimension_numbers<[1], [0], [0], [1], [0, 0, 1, 1], [], []>} : vector<16x8xbf16>, vector<8x64xbf16>, vector<16x64xf32> -> vector<16x64xf32>
    %75 = vector.extract_strided_slice %28 {offsets = [0, 8], sizes = [16, 8], strides = [1, 1]} : vector<16x32xf32> to vector<16x8xf32>
    %76 = arith.truncf %75 : vector<16x8xf32> to vector<16x8xbf16>
    %77 = vector.extract_strided_slice %17 {offsets = [0, 8], sizes = [32, 8], strides = [1, 1]} : vector<32x32xf32> to vector<32x8xf32>
    %78 = arith.truncf %77 : vector<32x8xf32> to vector<32x8xbf16>
    "tpu.trace_start"() <{level = 10 : i32, message = "qd,kd->qk"}> : () -> ()
    %cst_48 = arith.constant dense<0.000000e+00> : vector<16x32xf32>
    %79 = tpu.matmul %76, %78, %cst_48 {dimension_numbers = #tpu.dot_dimension_numbers<[1], [1], [0], [0], [0, 0, 1, 0], [], []>} : vector<16x8xbf16>, vector<32x8xbf16>, vector<16x32xf32> -> vector<16x32xf32>
    "tpu.trace_stop"() : () -> ()
    %80 = arith.select %43, %79, %46 : vector<16x32xi1>, vector<16x32xf32>
    %cst_49 = arith.constant dense<0xFF800000> : vector<16xf32>
    %81 = vector.multi_reduction <maximumf>, %80, %cst_49 [1] : vector<16x32xf32> to vector<16xf32>
    %82 = vector.shape_cast %81 : vector<16xf32> to vector<16x1xf32>
    %83 = vector.broadcast %82 : vector<16x1xf32> to vector<16x32xf32>
    %84 = arith.subf %80, %83 : vector<16x32xf32>
    %85 = math.exp %84 : vector<16x32xf32>
    %cst_50 = arith.constant dense<0.000000e+00> : vector<16xf32>
    %86 = vector.multi_reduction <add>, %85, %cst_50 [1] : vector<16x32xf32> to vector<16xf32>
    %87 = vector.shape_cast %86 : vector<16xf32> to vector<16x1xf32>
    %88 = tpu.reciprocal %87 {approx = true} : vector<16x1xf32> -> vector<16x1xf32>
    %89 = vector.broadcast %88 : vector<16x1xf32> to vector<16x32xf32>
    %90 = arith.mulf %85, %89 : vector<16x32xf32>
    %91 = arith.truncf %90 : vector<16x32xf32> to vector<16x32xbf16>
    %c0_51 = arith.constant 0 : index
    %c1_52 = arith.constant 1 : index
    %c0_53 = arith.constant 0 : index
    %c0_54 = arith.constant 0 : index
    %92 = vector.load %arg14[%c0_51, %c1_52, %c0_53, %c0_54] : memref<1x4x16x32xbf16, #tpu.memory_space<vmem>>, vector<1x1x16x32xbf16>
    %93 = vector.shape_cast %92 : vector<1x1x16x32xbf16> to vector<16x32xbf16>
    %94 = vector.shape_cast %91 : vector<16x32xbf16> to vector<1x1x16x32xbf16>
    tpu.vector_store %arg14[%c0_51, %c1_52, %c0_53, %c0_54], %94 {strides = array<i32>} : memref<1x4x16x32xbf16, #tpu.memory_space<vmem>>, vector<1x1x16x32xbf16>,
    %95 = arith.truncf %90 : vector<16x32xf32> to vector<16x32xbf16>
    %96 = vector.extract_strided_slice %8 {offsets = [0, 8], sizes = [32, 8], strides = [1, 1]} : vector<32x32xf32> to vector<32x8xf32>
    %97 = arith.truncf %96 : vector<32x8xf32> to vector<32x8xbf16>
    %cst_55 = arith.constant dense<0.000000e+00> : vector<16x8xf32>
    %98 = tpu.matmul %95, %97, %cst_55 {dimension_numbers = #tpu.dot_dimension_numbers<[1], [0], [0], [1], [0, 0, 1, 1], [], []>} : vector<16x32xbf16>, vector<32x8xbf16>, vector<16x8xf32> -> vector<16x8xf32>
    %99 = arith.truncf %98 : vector<16x8xf32> to vector<16x8xbf16>
    %c0_56 = arith.constant 0 : index
    %c8 = arith.constant 8 : index
    %c0_57 = arith.constant 0 : index
    %100 = vector.load %arg11[%c0_56, %c8, %c0_57] : memref<1x32x64xbf16, #tpu.memory_space<vmem>>, vector<1x8x64xbf16>
    %101 = vector.shape_cast %100 : vector<1x8x64xbf16> to vector<8x64xbf16>
    %cst_58 = arith.constant dense<0.000000e+00> : vector<16x64xf32>
    %102 = tpu.matmul %99, %101, %cst_58 {dimension_numbers = #tpu.dot_dimension_numbers<[1], [0], [0], [1], [0, 0, 1, 1], [], []>} : vector<16x8xbf16>, vector<8x64xbf16>, vector<16x64xf32> -> vector<16x64xf32>
    %103 = arith.addf %74, %102 : vector<16x64xf32>
    %104 = vector.extract_strided_slice %28 {offsets = [0, 16], sizes = [16, 8], strides = [1, 1]} : vector<16x32xf32> to vector<16x8xf32>
    %105 = arith.truncf %104 : vector<16x8xf32> to vector<16x8xbf16>
    %106 = vector.extract_strided_slice %17 {offsets = [0, 16], sizes = [32, 8], strides = [1, 1]} : vector<32x32xf32> to vector<32x8xf32>
    %107 = arith.truncf %106 : vector<32x8xf32> to vector<32x8xbf16>
    "tpu.trace_start"() <{level = 10 : i32, message = "qd,kd->qk"}> : () -> ()
    %cst_59 = arith.constant dense<0.000000e+00> : vector<16x32xf32>
    %108 = tpu.matmul %105, %107, %cst_59 {dimension_numbers = #tpu.dot_dimension_numbers<[1], [1], [0], [0], [0, 0, 1, 0], [], []>} : vector<16x8xbf16>, vector<32x8xbf16>, vector<16x32xf32> -> vector<16x32xf32>
    "tpu.trace_stop"() : () -> ()
    %109 = arith.select %43, %108, %46 : vector<16x32xi1>, vector<16x32xf32>
    %cst_60 = arith.constant dense<0xFF800000> : vector<16xf32>
    %110 = vector.multi_reduction <maximumf>, %109, %cst_60 [1] : vector<16x32xf32> to vector<16xf32>
    %111 = vector.shape_cast %110 : vector<16xf32> to vector<16x1xf32>
    %112 = vector.broadcast %111 : vector<16x1xf32> to vector<16x32xf32>
    %113 = arith.subf %109, %112 : vector<16x32xf32>
    %114 = math.exp %113 : vector<16x32xf32>
    %cst_61 = arith.constant dense<0.000000e+00> : vector<16xf32>
    %115 = vector.multi_reduction <add>, %114, %cst_61 [1] : vector<16x32xf32> to vector<16xf32>
    %116 = vector.shape_cast %115 : vector<16xf32> to vector<16x1xf32>
    %117 = tpu.reciprocal %116 {approx = true} : vector<16x1xf32> -> vector<16x1xf32>
    %118 = vector.broadcast %117 : vector<16x1xf32> to vector<16x32xf32>
    %119 = arith.mulf %114, %118 : vector<16x32xf32>
    %120 = arith.truncf %119 : vector<16x32xf32> to vector<16x32xbf16>
    %c0_62 = arith.constant 0 : index
    %c2_63 = arith.constant 2 : index
    %c0_64 = arith.constant 0 : index
    %c0_65 = arith.constant 0 : index
    %121 = vector.load %arg14[%c0_62, %c2_63, %c0_64, %c0_65] : memref<1x4x16x32xbf16, #tpu.memory_space<vmem>>, vector<1x1x16x32xbf16>
    %122 = vector.shape_cast %121 : vector<1x1x16x32xbf16> to vector<16x32xbf16>
    %123 = vector.shape_cast %120 : vector<16x32xbf16> to vector<1x1x16x32xbf16>
    tpu.vector_store %arg14[%c0_62, %c2_63, %c0_64, %c0_65], %123 {strides = array<i32>} : memref<1x4x16x32xbf16, #tpu.memory_space<vmem>>, vector<1x1x16x32xbf16>,
    %124 = arith.truncf %119 : vector<16x32xf32> to vector<16x32xbf16>
    %125 = vector.extract_strided_slice %8 {offsets = [0, 16], sizes = [32, 8], strides = [1, 1]} : vector<32x32xf32> to vector<32x8xf32>
    %126 = arith.truncf %125 : vector<32x8xf32> to vector<32x8xbf16>
    %cst_66 = arith.constant dense<0.000000e+00> : vector<16x8xf32>
    %127 = tpu.matmul %124, %126, %cst_66 {dimension_numbers = #tpu.dot_dimension_numbers<[1], [0], [0], [1], [0, 0, 1, 1], [], []>} : vector<16x32xbf16>, vector<32x8xbf16>, vector<16x8xf32> -> vector<16x8xf32>
    %128 = arith.truncf %127 : vector<16x8xf32> to vector<16x8xbf16>
    %c0_67 = arith.constant 0 : index
    %c16 = arith.constant 16 : index
    %c0_68 = arith.constant 0 : index
    %129 = vector.load %arg11[%c0_67, %c16, %c0_68] : memref<1x32x64xbf16, #tpu.memory_space<vmem>>, vector<1x8x64xbf16>
    %130 = vector.shape_cast %129 : vector<1x8x64xbf16> to vector<8x64xbf16>
    %cst_69 = arith.constant dense<0.000000e+00> : vector<16x64xf32>
    %131 = tpu.matmul %128, %130, %cst_69 {dimension_numbers = #tpu.dot_dimension_numbers<[1], [0], [0], [1], [0, 0, 1, 1], [], []>} : vector<16x8xbf16>, vector<8x64xbf16>, vector<16x64xf32> -> vector<16x64xf32>
    %132 = arith.addf %103, %131 : vector<16x64xf32>
    %133 = vector.extract_strided_slice %28 {offsets = [0, 24], sizes = [16, 8], strides = [1, 1]} : vector<16x32xf32> to vector<16x8xf32>
    %134 = arith.truncf %133 : vector<16x8xf32> to vector<16x8xbf16>
    %135 = vector.extract_strided_slice %17 {offsets = [0, 24], sizes = [32, 8], strides = [1, 1]} : vector<32x32xf32> to vector<32x8xf32>
    %136 = arith.truncf %135 : vector<32x8xf32> to vector<32x8xbf16>
    "tpu.trace_start"() <{level = 10 : i32, message = "qd,kd->qk"}> : () -> ()
    %cst_70 = arith.constant dense<0.000000e+00> : vector<16x32xf32>
    %137 = tpu.matmul %134, %136, %cst_70 {dimension_numbers = #tpu.dot_dimension_numbers<[1], [1], [0], [0], [0, 0, 1, 0], [], []>} : vector<16x8xbf16>, vector<32x8xbf16>, vector<16x32xf32> -> vector<16x32xf32>
    "tpu.trace_stop"() : () -> ()
    %138 = arith.select %43, %137, %46 : vector<16x32xi1>, vector<16x32xf32>
    %cst_71 = arith.constant dense<0xFF800000> : vector<16xf32>
    %139 = vector.multi_reduction <maximumf>, %138, %cst_71 [1] : vector<16x32xf32> to vector<16xf32>
    %140 = vector.shape_cast %139 : vector<16xf32> to vector<16x1xf32>
    %141 = vector.broadcast %140 : vector<16x1xf32> to vector<16x32xf32>
    %142 = arith.subf %138, %141 : vector<16x32xf32>
    %143 = math.exp %142 : vector<16x32xf32>
    %cst_72 = arith.constant dense<0.000000e+00> : vector<16xf32>
    %144 = vector.multi_reduction <add>, %143, %cst_72 [1] : vector<16x32xf32> to vector<16xf32>
    %145 = vector.shape_cast %144 : vector<16xf32> to vector<16x1xf32>
    %146 = tpu.reciprocal %145 {approx = true} : vector<16x1xf32> -> vector<16x1xf32>
    %147 = vector.broadcast %146 : vector<16x1xf32> to vector<16x32xf32>
    %148 = arith.mulf %143, %147 : vector<16x32xf32>
    %149 = arith.truncf %148 : vector<16x32xf32> to vector<16x32xbf16>
    %c0_73 = arith.constant 0 : index
    %c3 = arith.constant 3 : index
    %c0_74 = arith.constant 0 : index
    %c0_75 = arith.constant 0 : index
    %150 = vector.load %arg14[%c0_73, %c3, %c0_74, %c0_75] : memref<1x4x16x32xbf16, #tpu.memory_space<vmem>>, vector<1x1x16x32xbf16>
    %151 = vector.shape_cast %150 : vector<1x1x16x32xbf16> to vector<16x32xbf16>
    %152 = vector.shape_cast %149 : vector<16x32xbf16> to vector<1x1x16x32xbf16>
    tpu.vector_store %arg14[%c0_73, %c3, %c0_74, %c0_75], %152 {strides = array<i32>} : memref<1x4x16x32xbf16, #tpu.memory_space<vmem>>, vector<1x1x16x32xbf16>,
    %153 = arith.truncf %148 : vector<16x32xf32> to vector<16x32xbf16>
    %154 = vector.extract_strided_slice %8 {offsets = [0, 24], sizes = [32, 8], strides = [1, 1]} : vector<32x32xf32> to vector<32x8xf32>
    %155 = arith.truncf %154 : vector<32x8xf32> to vector<32x8xbf16>
    %cst_76 = arith.constant dense<0.000000e+00> : vector<16x8xf32>
    %156 = tpu.matmul %153, %155, %cst_76 {dimension_numbers = #tpu.dot_dimension_numbers<[1], [0], [0], [1], [0, 0, 1, 1], [], []>} : vector<16x32xbf16>, vector<32x8xbf16>, vector<16x8xf32> -> vector<16x8xf32>
    %157 = arith.truncf %156 : vector<16x8xf32> to vector<16x8xbf16>
    %c0_77 = arith.constant 0 : index
    %c24 = arith.constant 24 : index
    %c0_78 = arith.constant 0 : index
    %158 = vector.load %arg11[%c0_77, %c24, %c0_78] : memref<1x32x64xbf16, #tpu.memory_space<vmem>>, vector<1x8x64xbf16>
    %159 = vector.shape_cast %158 : vector<1x8x64xbf16> to vector<8x64xbf16>
    %cst_79 = arith.constant dense<0.000000e+00> : vector<16x64xf32>
    %160 = tpu.matmul %157, %159, %cst_79 {dimension_numbers = #tpu.dot_dimension_numbers<[1], [0], [0], [1], [0, 0, 1, 1], [], []>} : vector<16x8xbf16>, vector<8x64xbf16>, vector<16x64xf32> -> vector<16x64xf32>
    %161 = arith.addf %132, %160 : vector<16x64xf32>
    %c0_i32 = arith.constant 0 : i32
    %162 = arith.cmpi eq, %arg2, %c0_i32 : i32
    %163 = arith.extui %162 : i1 to i32
    %c0_i32_80 = arith.constant 0 : i32
    %164 = arith.cmpi ne, %163, %c0_i32_80 : i32
    scf.if %164 {
      %c0_83 = arith.constant 0 : index
      %c0_84 = arith.constant 0 : index
      %168 = vector.load %arg12[%c0_83, %c0_84] : memref<1x64xf32, #tpu.memory_space<vmem>>, vector<1x64xf32>
      %169 = vector.broadcast %168 : vector<1x64xf32> to vector<16x64xf32>
      %170 = arith.addf %161, %169 : vector<16x64xf32>
      %c0_85 = arith.constant 0 : index
      %c0_86 = arith.constant 0 : index
      %c0_87 = arith.constant 0 : index
      %171 = vector.load %arg13[%c0_85, %c0_86, %c0_87] : memref<1x16x64xf32, #tpu.memory_space<vmem>>, vector<1x16x64xf32>
      %172 = vector.shape_cast %171 : vector<1x16x64xf32> to vector<16x64xf32>
      %173 = vector.shape_cast %170 : vector<16x64xf32> to vector<1x16x64xf32>
      tpu.vector_store %arg13[%c0_85, %c0_86, %c0_87], %173 {strides = array<i32>} : memref<1x16x64xf32, #tpu.memory_space<vmem>>, vector<1x16x64xf32>,
    } else {
    }
    %c0_i32_81 = arith.constant 0 : i32
    %165 = arith.cmpi sgt, %arg2, %c0_i32_81 : i32
    %166 = arith.extui %165 : i1 to i32
    %c0_i32_82 = arith.constant 0 : i32
    %167 = arith.cmpi ne, %166, %c0_i32_82 : i32
    scf.if %167 {
      %c0_83 = arith.constant 0 : index
      %c0_84 = arith.constant 0 : index
      %c0_85 = arith.constant 0 : index
      %168 = vector.load %arg13[%c0_83, %c0_84, %c0_85] : memref<1x16x64xf32, #tpu.memory_space<vmem>>, vector<1x16x64xf32>
      %169 = vector.shape_cast %168 : vector<1x16x64xf32> to vector<16x64xf32>
      %170 = arith.addf %169, %161 : vector<16x64xf32>
      %c0_86 = arith.constant 0 : index
      %c0_87 = arith.constant 0 : index
      %c0_88 = arith.constant 0 : index
      %171 = vector.load %arg13[%c0_86, %c0_87, %c0_88] : memref<1x16x64xf32, #tpu.memory_space<vmem>>, vector<1x16x64xf32>
      %172 = vector.shape_cast %171 : vector<1x16x64xf32> to vector<16x64xf32>
      %173 = vector.shape_cast %170 : vector<16x64xf32> to vector<1x16x64xf32>
      tpu.vector_store %arg13[%c0_86, %c0_87, %c0_88], %173 {strides = array<i32>} : memref<1x16x64xf32, #tpu.memory_space<vmem>>, vector<1x16x64xf32>,
    } else {
    }
    return
  }
  func.func @transform_0(%arg0: i32, %arg1: i32, %arg2: i32) -> (i32, i32, i32) {
    %c0_i32 = arith.constant 0 : i32
    %c0_i32_0 = arith.constant 0 : i32
    %c0_i32_1 = arith.constant 0 : i32
    return %arg0, %c0_i32, %c0_i32_0 : i32, i32, i32
  }
  func.func @transform_1(%arg0: i32, %arg1: i32, %arg2: i32) -> (i32, i32, i32) {
    %c0_i32 = arith.constant 0 : i32
    %c0_i32_0 = arith.constant 0 : i32
    %c0_i32_1 = arith.constant 0 : i32
    return %arg0, %c0_i32, %c0_i32_0 : i32, i32, i32
  }
  func.func @transform_2(%arg0: i32, %arg1: i32, %arg2: i32) -> (i32, i32, i32) {
    %c0_i32 = arith.constant 0 : i32
    %c0_i32_0 = arith.constant 0 : i32
    return %arg0, %arg1, %c0_i32 : i32, i32, i32
  }
  func.func @transform_3(%arg0: i32, %arg1: i32, %arg2: i32) -> (i32, i32, i32) {
    %c0_i32 = arith.constant 0 : i32
    %c0_i32_0 = arith.constant 0 : i32
    %c0_i32_1 = arith.constant 0 : i32
    return %arg0, %c0_i32, %c0_i32_0 : i32, i32, i32
  }
  func.func @transform_4(%arg0: i32, %arg1: i32, %arg2: i32) -> (i32, i32, i32) {
    %c0_i32 = arith.constant 0 : i32
    %c0_i32_0 = arith.constant 0 : i32
    %c0_i32_1 = arith.constant 0 : i32
    return %arg2, %c0_i32, %c0_i32_0 : i32, i32, i32
  }
  func.func @transform_5(%arg0: i32, %arg1: i32, %arg2: i32) -> (i32, i32, i32) {
    %c0_i32 = arith.constant 0 : i32
    %c0_i32_0 = arith.constant 0 : i32
    %c0_i32_1 = arith.constant 0 : i32
    return %arg2, %c0_i32, %c0_i32_0 : i32, i32, i32
  }
  func.func @transform_6(%arg0: i32, %arg1: i32, %arg2: i32) -> (i32, i32, i32) {
    %c0_i32 = arith.constant 0 : i32
    %c0_i32_0 = arith.constant 0 : i32
    %c0_i32_1 = arith.constant 0 : i32
    return %arg2, %c0_i32, %c0_i32_0 : i32, i32, i32
  }
  func.func @transform_7(%arg0: i32, %arg1: i32, %arg2: i32) -> (i32, i32, i32, i32) {
    %c0_i32 = arith.constant 0 : i32
    %c0_i32_0 = arith.constant 0 : i32
    %c0_i32_1 = arith.constant 0 : i32
    %c0_i32_2 = arith.constant 0 : i32
    return %arg2, %c0_i32, %c0_i32_0, %c0_i32_1 : i32, i32, i32, i32
  }
  func.func @transform_8(%arg0: i32, %arg1: i32, %arg2: i32) -> (i32, i32, i32) {
    %c0_i32 = arith.constant 0 : i32
    %c0_i32_0 = arith.constant 0 : i32
    %c0_i32_1 = arith.constant 0 : i32
    return %arg2, %c0_i32, %c0_i32_0 : i32, i32, i32
  }
  func.func @transform_9(%arg0: i32, %arg1: i32, %arg2: i32) -> (i32, i32) {
    %c0_i32 = arith.constant 0 : i32
    %c0_i32_0 = arith.constant 0 : i32
    %c0_i32_1 = arith.constant 0 : i32
    return %c0_i32, %c0_i32_0 : i32, i32
  }
  func.func @transform_10(%arg0: i32, %arg1: i32, %arg2: i32) -> (i32, i32, i32) {
    %c0_i32 = arith.constant 0 : i32
    %c0_i32_0 = arith.constant 0 : i32
    return %arg0, %arg1, %c0_i32 : i32, i32, i32
  }
  func.func @transform_11(%arg0: i32, %arg1: i32, %arg2: i32) -> (i32, i32, i32, i32) {
    %c0_i32 = arith.constant 0 : i32
    %c0_i32_0 = arith.constant 0 : i32
    return %arg0, %arg2, %arg1, %c0_i32 : i32, i32, i32, i32
  }
}

</mosaic_0001>

<bundles_post_ra>
// kernel: tpu_custom_call.1
= control target key start
LH: loop header
LB: loop body
LE: loop exit
PB: predicated region body
PF: predicated region fallthrough
CT: control target
= control target key end

     0   :  { %s2586_s0 = inlined_call_operand.vmem [shape: bf16[2,32,64], index: 0, kind: input, shape index: {}]   ;;  %s2587_s1 = inlined_call_operand.vmem [shape: bf16[2,32,64], index: 1, kind: input, shape index: {}]   ;;  %s2588_s2 = inlined_call_operand.vmem [shape: bf16[2,32,64], index: 2, kind: input, shape index: {}]   ;;  %s2589_s3 = inlined_call_operand.vmem [shape: f32[2,1,32], index: 3, kind: input, shape index: {}]   ;;  %s2590_s4 = inlined_call_operand.vmem [shape: bf16[2,64,32], index: 4, kind: input, shape index: {}]   ;;  %s2591_s5 = inlined_call_operand.vmem [shape: bf16[2,64,32], index: 5, kind: input, shape index: {}]   ;;  %s2592_s6 = inlined_call_operand.vmem [shape: bf16[2,64,32], index: 6, kind: input, shape index: {}]   ;;  %s2593_s7 = inlined_call_operand.vmem [shape: f32[2,3,1,32], index: 7, kind: input, shape index: {}]   ;;  %s2594_s8 = inlined_call_operand.vmem [shape: bf16[2,32,64], index: 8, kind: input, shape index: {}]   ;;  %s2595_s9 = inlined_call_operand.vmem [shape: f32[1,64], index: 9, kind: input, shape index: {}]   ;;  %s2596_s10 = inlined_call_operand.hbm [shape: f32[2,32,64], index: 10, kind: output, shape index: {0}]   ;;  %s2597_s11 = inlined_call_operand.hbm [shape: bf16[2,8,32,32], index: 11, kind: output, shape index: {1}]  }
   0x1   :  { %2614 = sst [smem:[#allocation25_spill]] %s2586_s0 }
   0x2   :  { %2615 = sst [smem:[#allocation26_spill]] %s2591_s5 }
   0x3   :  { %2616 = sst [smem:[#allocation27_spill]] %s2592_s6 }
   0x4   :  { %2617 = sst [smem:[#allocation28_spill]] %s2594_s8 }
   0x5   :  { %2618 = sst [smem:[#allocation29_spill]] %s2595_s9 }
   0x6   :  { %2619 = sst [smem:[#allocation30_spill]] %s2596_s10 }
   0x7   :  { %2620 = sst [smem:[#allocation31_spill]] %s2597_s11 }
   0x8   :  { %17 = vsyncpa [#allocation3], 0 }
   0x9   :  { %19 = vsyncpa [#allocation3 + $0x1], 0 }
   0xa   :  { %20 = vsyncpa [#allocation5], 0 }
   0xb   :  { %22 = vsyncpa [#allocation5 + $0x1], 0  ;;  %s2122_s17 = smov 0   ;;  %s2124_s18 = smov 0  }
   0xc   :  { %s2126_s19 = smov 0   ;;  %s2128_s20 = smov 0  }
   0xd   :  { %s2130_s21 = smov 0   ;;  %s2132_s22 = smov 0  }
   0xe   :  { %s2134_s23 = smov 0   ;;  %s2136_s24 = smov 0  }
   0xf   :  { %s2138_s25 = smov 0   ;;  %s2140_s26 = smov 0  }
  0x10   :  { %s2142_s27 = smov 0   ;;  %s2144_s28 = smov 0  }
  0x11   :  { %s2146_s29 = smov 0  }
  0x12 LB: > { %2621 = sst [smem:[#allocation10_spill]] %s1998_s17  ;;  %s1581_s30 = sadd.s32 4294967295, %s2046_s29   ;;  %s2046_s29 = sphi %s2146_s29, %s28_s29   ;;  %s2042_s28 = sphi %s2144_s28, %s2671_s28   ;;  %s2038_s27 = sphi %s2142_s27, %s2670_s27   ;;  %s2034_s26 = sphi %s2140_s26, %s2669_s26   ;;  %s2030_s25 = sphi %s2138_s25, %s2668_s25   ;;  %s2026_s24 = sphi %s2136_s24, %s2667_s24   ;;  %s2022_s23 = sphi %s2134_s23, %s2666_s23   ;;  %s2018_s22 = sphi %s2132_s22, %s2665_s22   ;;  %s2014_s21 = sphi %s2130_s21, %s2676_s21   ;;  %s2010_s20 = sphi %s2128_s20, %s2675_s20   ;;  %s2006_s19 = sphi %s2126_s19, %s2663_s19   ;;  %s2002_s18 = sphi %s2124_s18, %s2674_s18   ;;  %s1998_s17 = sphi %s2122_s17, %s2673_s17  }
  0x13   : > { %2622 = sst [smem:[#allocation11_spill]] %s2006_s19  ;;  %s1582_s12 = sadd.s32 4294967294, %s2046_s29  }
  0x14   : > { %2623 = sst [smem:[#allocation12_spill]] %s2010_s20  ;;  %s40_s13 = sadd.s32 1, %s2034_s26 }
  0x15   : > { %2624 = sst [smem:[#allocation13_spill]] %s2018_s22  ;;  %s43_s14 = sadd.s32 1, %s2038_s27 }
  0x16   : > { %2625 = sst [smem:[#allocation14_spill]] %s2034_s26  ;;  %p41_p0 = scmp.ge.s32.totalorder %s40_s13, 2 }
  0x17   : > { %2626 = sst [smem:[#allocation15_spill]] %s2038_s27  ;;  %s47_s15 = sadd.s32 1, %s2042_s28 }
  0x18   : > { %2627 = sst [smem:[#allocation16_spill]] %s2042_s28  ;;  %p323_p1 = scmp.ne.s32.totalorder %s2018_s22, %s2014_s21 }
  0x19   : > { %s2678_s13 = smov (%p41_p0, %s40_s13), 0  ;;  %s2680_s14 = smov (!%p41_p0, %s43_s14), %s2038_s27 }
  0x1a   : > { %2628 = sst [smem:[#allocation17_spill]] %s2678_s13  ;;  %p2198_p2 = scmp.eq.s32.totalorder %s1581_s30, 7 }
  0x1b   : > { %p329_p3 = scmp.ne.s32.totalorder %s2014_s21, %s2010_s20  ;;  %p45_p4 = scmp.ge.s32.totalorder %s2680_s14, 2 }
  0x1c   : > { %p2204_p5 = scmp.eq.s32.totalorder %s1582_s12, 7  ;;  %p2210_p6 = por %p2198_p2, %p323_p1 }
  0x1d   : > { %s337_s30 = ssub.s32 %s2034_s26, %s2678_s13  ;;  %s2682_s14 = smov (%p45_p4, %s2680_s14), 0 }
  0x1e   : > { %s2631_s10 = scalar_select %p2210_p6, 1, 0 }
  0x1f   : > { %2633 = sst [smem:[#allocation19_spill]] %s2682_s14  ;;  %s2684_s15 = smov (!%p45_p4, %s47_s15), %s2042_s28 }
  0x20   : > { %2632 = sst [smem:[#allocation18_spill]] %s2631_s10  ;;  %s309_s20 = ssub.s32 %s2038_s27, %s2682_s14 }
  0x21   : > { %p2223_p7 = por %p2204_p5, %p329_p3  ;;  %p49_p8 = scmp.ge.s32.totalorder %s2684_s15, 2 }
  0x22   : > { %s343_s9 = sadd.s32 1, %s2006_s19  ;;  %p353_p9 = scmp.ne.s32.totalorder %s2006_s19, %s2002_s18 }
  0x23   : > { %s2634_s12 = scalar_select %p2223_p7, 1, 0 }
  0x24   : > { %p359_p10 = scmp.ne.s32.totalorder %s2002_s18, %s1998_s17  ;;  %s2686_s15 = smov (%p49_p8, %s2684_s15), 0 }
  0x25   : > { %2635 = sst [smem:[#allocation20_spill]] %s2634_s12  ;;  %p2236_p11 = por %p353_p9, %p2198_p2 }
  0x26   : > { %2636 = sst [smem:[#allocation21_spill]] %s2686_s15  ;;  %p2242_p12 = por %p359_p10, %p2204_p5 }
  0x27   : > { %s308_s27 = ssub.s32 %s2042_s28, %s2686_s15  ;;  %p1585_p13 = scmp.ge.s32.totalorder %s2046_s29, 1 }
  0x28   : > { %s2638_s14 = scalar_select %p2242_p12, 1, 0 }
  0x29   : > { %s310_s26 = sor.u32 %s309_s20, %s308_s27  ;;  %s338_s12 = sor.u32 %s337_s30, %s308_s27 }
  0x2a   : > { %2639 = sst [smem:[#allocation22_spill]] %s2638_s14  ;;  %p311_p0 = scmp.eq.s32.totalorder %s310_s26, 0 }
  0x2b   : > { %s340_s10 = sor.u32 %s338_s12, %s309_s20  ;;  %p455_p3 = scmp.lt.s32.totalorder %s2046_s29, 9 }
  0x2c   : > { %p341_p1 = scmp.eq.s32.totalorder %s340_s10, 0  ;;  %s2640_s17 = sadd.s32 1, %s2018_s22 }
  0x2d   : > { %s2253_s11 = scalar_select %p311_p0, %s2018_s22, %s2640_s17  }
  0x2e   : > { %s2256_s8 = scalar_select %p341_p1, %s2006_s19, %s343_s9  }
  0x2f   : > { %2641 = sst [smem:[#allocation23_spill]] %s2253_s11  ;;  %p456_p2 = pnand %p1585_p13, %p455_p3 }
  0x30   : > { %2642 = sst [smem:[#allocation24_spill]] %s2256_s8  ;;  %p564_p4 = scmp.lt.s32.totalorder (!%p456_p2), %s2022_s23, 1 }
  0x31   : > { %459 = sbr.rel (%p456_p2) target bundleno = 1549 (0x60d), region = 60  ;;  %p541_p5 = scmp.lt.s32.totalorder (!%p456_p2), %s2030_s25, 1 }
  0x32   : > { %s2261_s16 = sshll.u32 (!%p456_p2), %s2026_s24, 1  ;;  %s2643_s5 = sld [smem:[#allocation26_spill]] (!%p456_p2) }
  0x33   : > { %p554_p8 = scmp.lt.s32.totalorder (!%p456_p2), %s2261_s16, 3  ;;  %s2644_s6 = sld [smem:[#allocation27_spill]] (!%p456_p2) }
  0x34   : > { %s2649_s0 = sld [smem:[#allocation25_spill]] (!%p456_p2)  ;;  %p1697_p9 = scmp.ne.s32.totalorder (!%p456_p2), %s2022_s23, 0 }
  0x36   : > { %s2264_s10 = scalar_select %p564_p4, %s2022_s23, 1  ;;  %vm642_vm0 = vcmask 523264   ;;  %vm838_vm1 = vcmask 64512   ;;  %v808_v39 = vlaneseq  ;;  %v2051_v50 = vmov 0  }
  0x37   : > { %s2267_s17 = scalar_select %p541_p5, %s2030_s25, 1  ;;  %v2052_v58 = vmov 0.0   ;;  %vm864_vm8 = vcmask 261120   ;;  %vm1014_vm11 = vcmask 1043456   ;;  %vm889_vm12 = vcmask 257024  }
  0x38   : > { %s2270_s9 = sshll.u32 %s2264_s10, 5  ;;  %s1735_s22 = smul.u32 3, %s2264_s10  ;;  %v809_v42 = vshrl.u32 %v808_v39, 7  ;;  %v815_v45 = vand.u32 127, %v808_v39 }
  0x39   : > { %s573_s27 = scalar_lea.vmem %s2643_s5, %s2270_s9  ;;  %s578_s15 = scalar_lea.vmem %s2644_s6, %s2270_s9 }
  0x3a   : > { %v1728_v0 = vld [vmem:[%s573_s27 + $0x18] sm:$0xff]  ;;  %s555_s28 = scalar_select %p554_p8, %s2261_s16, 3  ;;  %v1727_v2 = vld [vmem:[%s573_s27 + $0x10] sm:$0xff]  ;;  %v1726_v4 = vld [vmem:[%s573_s27 + $0x8] sm:$0xff]  ;;  %v810_v48 = vadd.s32 8, %v809_v42 }
  0x3b   : > { %v1733_v1 = vld [vmem:[%s578_s15 + $0x18] sm:$0xff]  ;;  %729 = vmatpush.bf16.msra.mxu1 %v1728_v0  ;;  %s1593_s11 = sshll.u32 %s2267_s17, 2  ;;  %v1732_v3 = vld [vmem:[%s578_s15 + $0x10] sm:$0xff]  ;;  %s2287_s20 = scalar_lea.vmem %s2593_s7, %s1735_s22  ;;  %v1731_v5 = vld [vmem:[%s578_s15 + $0x8] sm:$0xff] }
  0x3c   : > { %795 = vmatpush.bf16.msra.mxu2 %v1733_v1  ;;  %s557_s26 = sadd.s32 %s1593_s11, %s555_s28  ;;  %s1711_s5 = sshll.u32 %s2267_s17, 4  ;;  %v1725_v6 = vld [vmem:[%s573_s27] sm:$0xff] }
  0x3d   : > { %s1594_s30 = sshll.u32 %s557_s26, 2  ;;  %s550_s14 = scalar_lea.vmem %s2587_s1, %s1711_s5  ;;  %v1730_v7 = vld [vmem:[%s578_s15] sm:$0xff] }
  0x3e   : > { %s559_s22 = scalar_lea.vmem %s2588_s2, %s1594_s30  ;;  %v1723_v8 = vld [vmem:[%s550_s14] sm:$0xff]  ;;  %v1724_v10 = vld [vmem:[%s550_s14 + $0x8] sm:$0xff]  ;;  %s2048_s6 = smov 120  }
  0x3f   : > { %730 = vmatpush.bf16.msra.mxu1 %v1727_v2  ;;  %v1729_v9 = vld [vmem:[%s559_s22] sm:$0xff]  ;;  %s2049_s28 = smov 112   ;;  %s2050_s14 = smov 104  }
  0x40   : > { %796 = vmatpush.bf16.msra.mxu2 %v1732_v3  ;;  %v1872_v15 = vld [vmem:[%s2287_s20 + $0x1] ss:$0 sm:$0xff]  ;;  %v1873_v23 = vld [vmem:[%s2287_s20 + $0x2] ss:$0 sm:$0xff]  ;;  %s531_s15 = sand.u32 1, %s2014_s21   ;;  %s1678_s27 = sshll.u32 %s2026_s24, 4 }
  0x41   : > { %s2324_s11 = sshll.u32 %s531_s15, 4  ;;  %v811_v43 = vstv %s1678_s27  ;;  %s563_s12 = scalar_lea.vmem %s2589_s3, %s2267_s17 }
  0x42   : > { %v812_v44 = vadd.s32 %v811_v43, %v809_v42  ;;  %v826_v46 = vld [vmem:[%s563_s12] sm:$0x1]  ;;  %v813_v52 = vadd.s32 %v811_v43, %v810_v48  ;;  %s568_s19 = scalar_lea.vmem %s2590_s4, %s2270_s9  ;;  %s545_s27 = scalar_lea.vmem %s2649_s0, %s1711_s5 }
  0x43   : > { %731 = vmatpush.bf16.msra.mxu1 %v1726_v4  ;;  %vm827_vm2 = vcmp.gt.f32.partialorder %v826_v46, 0.0  ;;  %v1722_v2 = vld [vmem:[%s568_s19 + $0x18] sm:$0xff]  ;;  %s1716_s5 = sshll.u32 %s2264_s10, 4  ;;  %s2650_s30 = sld [smem:[#allocation28_spill]] }
  0x44   : > { %797 = vmatpush.bf16.msra.mxu2 %v1731_v5  ;;  %v816_v47 = vsub.s32 %v815_v45, %v812_v44  ;;  %v828_v51 = vsel %vm827_vm2, 1, %v2051_v50  ;;  %v817_v55 = vsub.s32 %v815_v45, %v813_v52  ;;  %653 = vmatpush.bf16.msra.mxu0 %v1722_v2  ;;  %v1721_v5 = vld [vmem:[%s568_s19 + $0x10] sm:$0xff]  ;;  %s2613_s12 = sand.u32 1, %s2002_s18   ;;  %s2651_s8 = sld [smem:[#allocation29_spill]] (!%p1697_p9) }
  0x45   : > { %v829_v53 = vperm.slane %v828_v51, 0  ;;  %s1587_s24 = sshll.u32 %s2613_s12, 5 }
  0x46   : > { %v819_v49 = vsub.s32 0, %v816_v47  ;;  %vm818_vm3 = vcmp.lt.s32.totalorder %v816_v47, 0  ;;  %v822_v56 = vsub.s32 0, %v817_v55  ;;  %vm821_vm6 = vcmp.lt.s32.totalorder %v817_v55, 0  ;;  %s2394_s10 = scalar_lea.vmem [#allocation4], %s1587_s24 }
  0x47   : > { %732 = vmatpush.bf16.msra.mxu1 %v1725_v6  ;;  %vm830_vm5 = vcmp.eq.s32.totalorder %v829_v53, 1 }
  0x48   : > { %798 = vmatpush.bf16.msra.mxu2 %v1730_v7  ;;  %v820_v54 = vsel %vm818_vm3, %v819_v49, %v816_v47  ;;  %v823_v61 = vsel %vm821_vm6, %v822_v56, %v817_v55  ;;  %654 = vmatpush.bf16.msra.mxu0 %v1721_v5  ;;  %v1720_v7 = vld [vmem:[%s568_s19 + $0x8] sm:$0xff] }
  0x49   : > { %vm824_vm4 = vcmp.le.s32.totalorder %v820_v54, 3  ;;  %vm825_vm9 = vcmp.le.s32.totalorder %v823_v61, 3 }
  0x4a   : > { %1654 = vmatmul.msk.bf16.vlgmr.msra.gmra.mxu1 %vm642_vm0, %v1723_v8  ;;  %vm2337_vm7 = vmand %vm824_vm4, %vm830_vm5  ;;  %v2341_v59 = vsel %vm824_vm4, -1e+30, %v2052_v58  ;;  %v2355_v1 = vsel %vm825_vm9, -1e+30, %v2052_v58  ;;  %v1719_v8 = vld [vmem:[%s568_s19] sm:$0xff] }
  0x4b   : > { %1677 = vmatmul.msk.bf16.vlgmr.msra.gmra.mxu2 %vm642_vm0, %v1729_v9  ;;  %vm2351_vm10 = vmand %vm825_vm9, %vm830_vm5  ;;  %v1717_v9 = vld [vmem:[%s545_s27] sm:$0xff] }
  0x4c   : > { %655 = vmatpush.bf16.msra.mxu0 %v1720_v7 }
  0x50   : > { %656 = vmatpush.bf16.msra.mxu0 %v1719_v8 }
  0x53   : > { %1627 = vmatmul.msk.bf16.vlgmr.msra.gmra.mxu0 %vm642_vm0, %v1717_v9 }
  0x5a   : > { %1655 = vmatmul.msk.bf16.gmra.mxu1 %vm642_vm0, %v1724_v10  ;;  %v1718_v10 = vld [vmem:[%s545_s27 + $0x8] sm:$0xff] }
  0x63   : > { %1628 = vmatmul.msk.bf16.gmra.mxu0 %vm642_vm0, %v1718_v10 }
  0xc7   : > { %v734_v11 = vpop.f32.mrf.mxu1 }
  0xc8   : > { %v735_v22 = vadd.f32 %v1872_v15, %v734_v11 }
  0xce   : > { %v800_v14 = vpop.f32.mrf.mxu2 }
  0xcf   : > { %v736_v12 = vpop.f32.mrf.mxu1  ;;  %v801_v26 = vadd.f32 %v1873_v23, %v800_v14 }
  0xd0   : > { %v737_v20 = vadd.f32 %v1872_v15, %v736_v12 }
  0xd1   : > { %v805_v29 = vmul.f32 0.125, %v801_v26 }
  0xd2   : > { %v836_v25 = vpack.c.bf16 %v737_v20, %v735_v22 }
  0xd4   : > { %v843_v28 = vsel %vm838_vm1, %v836_v25, 0 }
  0xd6   : > { %v802_v24 = vpop.f32.mrf.mxu2 }
  0xd7   : > { %v739_v13 = vpop.f32.mrf.mxu1  ;;  %v803_v27 = vadd.f32 %v1873_v23, %v802_v24  ;;  %v1874_v24 = vld [vmem:[%s2287_s20] ss:$0 sm:$0xff]  ;;  %s2387_s20 = scalar_lea.vmem %s2650_s30, %s1716_s5 }
  0xd8   : > { %v740_v17 = vadd.f32 %v1872_v15, %v739_v13 }
  0xd9   : > { %v806_v30 = vmul.f32 0.125, %v803_v27 }
  0xdb   : > { %v2311_v31 = vpack.c.bf16 %v806_v30, %v805_v29 }
  0xdf   : > { %v741_v16 = vpop.f32.mrf.mxu1 }
  0xe0   : > { %v742_v18 = vadd.f32 %v1872_v15, %v741_v16 }
  0xe2   : > { %v2302_v19 = vpack.c.bf16 %v742_v18, %v740_v17 }
  0xe4   : > { %925 = vrot.lane.b32.xlu2 %v2302_v19, %s2048_s6  ;;  %v846_v21 = vsel %vm838_vm1, %v2302_v19, 0 }
  0xe5   : > { %854 = vmatpush.bf16.xpose.msra.mxu3 %v846_v21  ;;  %v658_v21 = vpop.f32.mrf.mxu0 }
  0xe6   : > { %v659_v27 = vadd.f32 %v1874_v24, %v658_v21 }
  0xec   : > { %923 = vrot.lane.b32.xlu2 %v836_v25, %s2048_s6 }
  0xed   : > { %855 = vmatpush.bf16.xpose.msra.mxu3 %v843_v28  ;;  %v660_v22 = vpop.f32.mrf.mxu0 }
  0xee   : > { %v661_v28 = vadd.f32 %v1874_v24, %v660_v22 }
  0xf4   : > { %1056 = vrot.lane.b32.xlu2 %v2302_v19, %s2049_s28  ;;  %1679 = vmatmul.msk.bf16.vlgmr.msra.gmra.mxu3 %vm838_vm1, %v2311_v31 }
  0xf5   : > { %v663_v23 = vpop.f32.mrf.mxu0 }
  0xfc   : > { %1164 = vrot.lane.b32.xlu2 %v836_v25, %s2050_s14 }
  0xfd   : > { %v665_v26 = vpop.f32.mrf.mxu0 }
  0xfe   : > { %v666_v29 = vadd.f32 %v1874_v24, %v665_v26 }
 0x104   : > { %1054 = vrot.lane.b32.xlu2 %v836_v25, %s2049_s28  ;;  %v664_v25 = vadd.f32 %v1874_v24, %v663_v23 }
 0x106   : > { %v2377_v30 = vpack.c.bf16 %v666_v29, %v664_v25 }
 0x108   : > { %908 = vmatpush.bf16.msrb.mxu2 %v2377_v30 }
 0x10c   : > { %1052 = vrot.lane.b32.xlu2 %v2311_v31, %s2049_s28 }
 0x13e   : > { %v926_v32 = vpop.permute.xlu2 %925 }
 0x13f   : > { %v934_v33 = vsel %vm838_vm1, %v926_v32, 0  ;;  %v2379_v32 = vpack.c.bf16 %v661_v28, %v659_v27 }
 0x140   : > { %942 = vmatpush.bf16.xpose.msrb.mxu3 %v934_v33 }
 0x141   : > { %909 = vmatpush.bf16.msrb.mxu2 %v2379_v32 }
 0x146   : > { %v924_v34 = vpop.permute.xlu2 %923 }
 0x147   : > { %v931_v35 = vsel %vm838_vm1, %v924_v34, 0 }
 0x148   : > { %943 = vmatpush.bf16.xpose.msrb.mxu3 %v931_v35 }
 0x14e   : > { %v1057_v36 = vpop.permute.xlu2 %1056 }
 0x14f   : > { %v1065_v37 = vsel %vm838_vm1, %v1057_v36, 0 }
 0x150   : > { %1073 = vmatpush.bf16.xpose.msra.mxu3 %v1065_v37 }
 0x156   : > { %v2329_v38 = vpop.permute.xlu2 %1164 }
 0x157   : > { %v1172_v48 = vsel %vm838_vm1, %v2329_v38, 0 }
 0x15e   : > { %v1055_v40 = vpop.permute.xlu2 %1054 }
 0x15f   : > { %v1062_v41 = vsel %vm838_vm1, %v1055_v40, 0 }
 0x160   : > { %1074 = vmatpush.bf16.xpose.msra.mxu3 %v1062_v41 }
 0x166   : > { %v1053_v50 = vpop.permute.xlu2 %1052 }
 0x177   : > { %v857_v60 = vpop.f32.mrf.mxu3 }
 0x178   : > { %v862_v62 = vsel %vm2337_vm7, %v857_v60, %v2341_v59 }
 0x179   : > { %v865_v63 = vsel %vm864_vm8, %v862_v62, -inf }
 0x17a   : > { %866 = vmax.xlane.f32.xlu0 %v865_v63 }
 0x17f   : > { %v859_v3 = vpop.f32.mrf.mxu3 }
 0x180   : > { %v863_v4 = vsel %vm2351_vm10, %v859_v3, %v2355_v1 }
 0x181   : > { %v868_v6 = vsel %vm864_vm8, %v863_v4, -inf }
 0x182   : > { %869 = vmax.xlane.f32.xlu0 %v868_v6 }
 0x196   : > { %1166 = vrot.lane.b32.xlu0 %v2302_v19, %s2050_s14 }
 0x19e   : > { %1162 = vrot.lane.b32.xlu0 %v2311_v31, %s2050_s14 }
 0x1ed   : > { %v867_v11 = vpop.xlane.xlu0 %866 }
 0x1ee   : > { %v871_v12 = vsub.f32 %v862_v62, %v867_v11 }
 0x1f0   : > { %v873_v13 = vmul.f32 1.442695, %v871_v12 }
 0x1f2   : > { %1875 = vpow2.f32 %v873_v13 }
 0x1f5   : > { %v870_v14 = vpop.xlane.xlu0 %869 }
 0x1f6   : > { %v872_v15 = vsub.f32 %v863_v4, %v870_v14 }
 0x1f8   : > { %v1876_v16 = vpop.eup %1875  ;;  %v875_v17 = vmul.f32 1.442695, %v872_v15 }
 0x1f9   : > { %v877_v18 = vsel %vm864_vm8, %v1876_v16, 0.0 }
 0x1fa   : > { %1877 = vpow2.f32 %v875_v17  ;;  %878 = vadd.xlane.f32.xlu1 %v877_v18 }
 0x200   : > { %v1878_v19 = vpop.eup %1877 }
 0x201   : > { %v880_v20 = vsel %vm864_vm8, %v1878_v19, 0.0 }
 0x202   : > { %881 = vadd.xlane.f32.xlu1 %v880_v20 }
 0x208   : > { %v1167_v45 = vpop.permute.xlu0 %1166 }
 0x209   : > { %v1175_v47 = vsel %vm838_vm1, %v1167_v45, 0 }
 0x210   : > { %v1163_v62 = vpop.permute.xlu0 %1162 }
 0x21b   : > { %919 = vrot.lane.b32.xlu1 %v2311_v31, %s2048_s6  ;;  %v917_v31 = vld [vmem:[%s2387_s20] sm:$0xf] }
 0x21c   : > { %v1036_v33 = vsel %vm1014_vm11, %v917_v31, 0 }
 0x21d   : > { %1045 = vmatpush.bf16.msra.mxu2 %v1036_v33 }
 0x26d   : > { %v879_v34 = vpop.xlane.xlu1 %878 }
 0x26e   : > { %1879 = vrcp.f32 %v879_v34 }
 0x274   : > { %v1880_v35 = vpop.eup %1879 }
 0x275   : > { %v885_v36 = vmul.f32 %v1880_v35, %v1876_v16  ;;  %v882_v37 = vpop.xlane.xlu1 %881 }
 0x276   : > { %1881 = vrcp.f32 %v882_v37 }
 0x277   : > { %v887_v39 = vpack.c.bf16 %v885_v36, %v885_v36 }
 0x279   : > { %890 = vst.msk [vmem:[%s2394_s10] sm:$0xf] %vm889_vm12, %v887_v39  ;;  %v896_v43 = vunpack.c.l.b16 %v887_v39 }
 0x27c   : > { %v1882_v40 = vpop.eup %1881 }
 0x27d   : > { %v886_v41 = vmul.f32 %v1882_v40, %v1878_v19 }
 0x27f   : > { %v888_v42 = vpack.c.bf16 %v886_v41, %v886_v41 }
 0x281   : > { %891 = vst.msk [vmem:[%s2394_s10 + $0x4] sm:$0xf] %vm889_vm12, %v888_v42  ;;  %v897_v44 = vunpack.c.l.b16 %v888_v42 }
 0x283   : > { %v898_v46 = vpack.c.b16 %v897_v44, %v896_v43 }
 0x285   : > { %1680 = vmatmul.msk.bf16.vlgmr.msrb.gmra.mxu2 %vm864_vm8, %v898_v46 }
 0x286   : > { %1183 = vmatpush.bf16.xpose.msrb.mxu2 %v1175_v47 }
 0x28d   : > { %v920_v49 = vpop.permute.xlu1 %919 }
 0x28e   : > { %1184 = vmatpush.bf16.xpose.msrb.mxu2 %v1172_v48  ;;  %1681 = vmatmul.msk.bf16.vlgmr.msrb.gmra.mxu3 %vm838_vm1, %v920_v49 }
 0x29e   : > { %1687 = vmatmul.msk.bf16.vlgmr.msra.gmra.mxu3 %vm838_vm1, %v1053_v50 }
 0x308   : > { %v911_v51 = vpop.f32.mrf.mxu2 }
 0x310   : > { %v913_v52 = vpop.f32.mrf.mxu2 }
 0x311   : > { %v916_v53 = vpack.c.bf16 %v913_v52, %v911_v51  ;;  %v945_v54 = vpop.f32.mrf.mxu3 }
 0x312   : > { %v950_v55 = vsel %vm2337_vm7, %v945_v54, %v2341_v59 }
 0x313   : > { %1686 = vmatmul.msk.bf16.vlgmr.msra.gmra.mxu2 %vm838_vm1, %v916_v53  ;;  %v952_v56 = vsel %vm864_vm8, %v950_v55, -inf }
 0x314   : > { %953 = vmax.xlane.f32.xlu1 %v952_v56 }
 0x319   : > { %v947_v38 = vpop.f32.mrf.mxu3 }
 0x31a   : > { %v951_v58 = vsel %vm2351_vm10, %v947_v38, %v2355_v1 }
 0x31b   : > { %v955_v60 = vsel %vm864_vm8, %v951_v58, -inf }
 0x31c   : > { %956 = vmax.xlane.f32.xlu0 %v955_v60 }
 0x321   : > { %v1076_v61 = vpop.f32.mrf.mxu3 }
 0x322   : > { %v1081_v63 = vsel %vm2337_vm7, %v1076_v61, %v2341_v59 }
 0x323   : > { %1692 = vmatmul.msk.bf16.vlgmr.msrb.gmra.mxu2 %vm838_vm1, %v1163_v62  ;;  %v1083_v2 = vsel %vm864_vm8, %v1081_v63, -inf }
 0x324   : > { %1084 = vmax.xlane.f32.xlu0 %v1083_v2 }
 0x329   : > { %v1078_v23 = vpop.f32.mrf.mxu3 }
 0x32a   : > { %v1082_v24 = vsel %vm2351_vm10, %v1078_v23, %v2355_v1 }
 0x32b   : > { %v1086_v27 = vsel %vm864_vm8, %v1082_v24, -inf }
 0x387   : > { %v954_v3 = vpop.xlane.xlu1 %953 }
 0x388   : > { %v958_v4 = vsub.f32 %v950_v55, %v954_v3 }
 0x38a   : > { %v960_v5 = vmul.f32 1.442695, %v958_v4 }
 0x38c   : > { %1883 = vpow2.f32 %v960_v5  ;;  %v1010_v5 = vld [vmem:[%s2387_s20 + $0x4] sm:$0xf] }
 0x38f   : > { %v957_v6 = vpop.xlane.xlu0 %956 }
 0x390   : > { %v959_v7 = vsub.f32 %v951_v58, %v957_v6  ;;  %v1016_v6 = vsel %vm1014_vm11, %v1010_v5, 0 }
 0x391   : > { %1025 = vmatpush.bf16.msrb.mxu1 %v1016_v6 }
 0x392   : > { %v1884_v8 = vpop.eup %1883  ;;  %v962_v9 = vmul.f32 1.442695, %v959_v7 }
 0x393   : > { %v964_v10 = vsel %vm864_vm8, %v1884_v8, 0.0 }
 0x394   : > { %1885 = vpow2.f32 %v962_v9  ;;  %965 = vadd.xlane.f32.xlu1 %v964_v10 }
 0x396   : > { %v2421_v11 = vpop.f32.mrf.mxu2 }
 0x397   : > { %v1085_v12 = vpop.xlane.xlu0 %1084 }
 0x398   : > { %v1089_v13 = vsub.f32 %v1081_v63, %v1085_v12 }
 0x39a   : > { %v1886_v14 = vpop.eup %1885  ;;  %v1091_v15 = vmul.f32 1.442695, %v1089_v13 }
 0x39b   : > { %v967_v16 = vsel %vm864_vm8, %v1886_v14, 0.0 }
 0x39c   : > { %1887 = vpow2.f32 %v1091_v15  ;;  %968 = vadd.xlane.f32.xlu0 %v967_v16 }
 0x39e   : > { %v2424_v17 = vpop.f32.mrf.mxu2 }
 0x3a2   : > { %v1888_v18 = vpop.eup %1887 }
 0x3a3   : > { %v1095_v19 = vsel %vm864_vm8, %v1888_v18, 0.0 }
 0x3a4   : > { %1096 = vadd.xlane.f32.xlu0 %v1095_v19 }
 0x3a6   : > { %v1186_v20 = vpop.f32.mrf.mxu2 }
 0x3a7   : > { %v1191_v21 = vsel %vm2337_vm7, %v1186_v20, %v2341_v59 }
 0x3a8   : > { %v1193_v22 = vsel %vm864_vm8, %v1191_v21, -inf }
 0x3a9   : > { %1194 = vmax.xlane.f32.xlu2 %v1193_v22 }
 0x3ae   : > { %v1188_v25 = vpop.f32.mrf.mxu2 }
 0x3af   : > { %v1192_v26 = vsel %vm2351_vm10, %v1188_v25, %v2355_v1 }
 0x3b0   : > { %v1196_v28 = vsel %vm864_vm8, %v1192_v26, -inf }
 0x3b1   : > { %1087 = vmax.xlane.f32.xlu2 %v1086_v27  ;;  %1197 = vmax.xlane.f32.xlu1 %v1196_v28  ;;  %v1139_v28 = vld [vmem:[%s2387_s20 + $0x8] sm:$0xf] }
 0x3c9   : > { %988 = vrot.lane.b32.xlu2 %v2377_v30, %s2048_s6 }
 0x3ca   : > { %986 = vrot.lane.b32.xlu1 %v2379_v32, %s2048_s6  ;;  %s533_s6 = scalar_lea.vmem [#allocation2], %s2324_s11 }
 0x3d1   : > { %1227 = vrot.lane.b32.xlu2 %v2377_v30, %s2050_s14 }
 0x3d9   : > { %1225 = vrot.lane.b32.xlu2 %v2379_v32, %s2050_s14 }
 0x407   : > { %v966_v57 = vpop.xlane.xlu1 %965 }
 0x408   : > { %1889 = vrcp.f32 %v966_v57  ;;  %v1144_v57 = vsel %vm1014_vm11, %v1139_v28, 0 }
 0x409   : > { %1153 = vmatpush.bf16.msra.mxu1 %v1144_v57 }
 0x40e   : > { %v1890_v59 = vpop.eup %1889 }
 0x40f   : > { %v972_v0 = vmul.f32 %v1890_v59, %v1884_v8  ;;  %v969_v1 = vpop.xlane.xlu0 %968 }
 0x410   : > { %1891 = vrcp.f32 %v969_v1 }
 0x411   : > { %v974_v29 = vpack.c.bf16 %v972_v0, %v972_v0 }
 0x413   : > { %1682 = vst.msk [vmem:[%s2394_s10 + $0x8] sm:$0xf] %vm889_vm12, %v974_v29  ;;  %v981_v61 = vunpack.c.l.b16 %v974_v29 }
 0x416   : > { %v1892_v31 = vpop.eup %1891 }
 0x417   : > { %v973_v33 = vmul.f32 %v1892_v31, %v1886_v14  ;;  %v1097_v34 = vpop.xlane.xlu0 %1096 }
 0x418   : > { %1893 = vrcp.f32 %v1097_v34 }
 0x419   : > { %v975_v35 = vpack.c.bf16 %v973_v33, %v973_v33 }
 0x41b   : > { %1683 = vst.msk [vmem:[%s2394_s10 + $0xc] sm:$0xf] %vm889_vm12, %v975_v35  ;;  %v982_v38 = vunpack.c.l.b16 %v975_v35 }
 0x41c   : > { %v1195_v36 = vpop.xlane.xlu2 %1194 }
 0x41d   : > { %v1199_v37 = vsub.f32 %v1191_v21, %v1195_v36  ;;  %v983_v62 = vpack.c.b16 %v982_v38, %v981_v61 }
 0x41e   : > { %v1894_v39 = vpop.eup %1893 }
 0x41f   : > { %v1103_v40 = vmul.f32 %v1894_v39, %v1888_v18  ;;  %v1201_v41 = vmul.f32 1.442695, %v1199_v37 }
 0x421   : > { %v2451_v42 = vpack.c.bf16 %v1103_v40, %v1103_v40  ;;  %1895 = vpow2.f32 %v1201_v41 }
 0x423   : > { %1688 = vst.msk [vmem:[%s2394_s10 + $0x10] sm:$0xf] %vm889_vm12, %v2451_v42  ;;  %v1112_v21 = vunpack.c.l.b16 %v2451_v42 }
 0x424   : > { %v1088_v43 = vpop.xlane.xlu2 %1087  ;;  %v1198_v44 = vpop.xlane.xlu1 %1197 }
 0x425   : > { %v1090_v45 = vsub.f32 %v1082_v24, %v1088_v43  ;;  %v1200_v48 = vsub.f32 %v1192_v26, %v1198_v44  ;;  %v1249_v26 = vld [vmem:[%s2387_s20 + $0xc] sm:$0xf] }
 0x426   : > { %v1254_v27 = vsel %vm1014_vm11, %v1249_v26, 0 }
 0x427   : > { %v1896_v46 = vpop.eup %1895  ;;  %v1093_v47 = vmul.f32 1.442695, %v1090_v45  ;;  %v1203_v50 = vmul.f32 1.442695, %v1200_v48 }
 0x428   : > { %v1205_v49 = vsel %vm864_vm8, %v1896_v46, 0.0 }
 0x429   : > { %1897 = vpow2.f32 %v1093_v47  ;;  %1206 = vadd.xlane.f32.xlu1 %v1205_v49 }
 0x42a   : > { %1899 = vpow2.f32 %v1203_v50 }
 0x42c   : > { %v989_v51 = vpop.permute.xlu2 %988 }
 0x42d   : > { %1001 = vmatpush.bf16.msrb.mxu0 %v989_v51 }
 0x42f   : > { %v1898_v52 = vpop.eup %1897 }
 0x430   : > { %v1098_v53 = vsel %vm864_vm8, %v1898_v52, 0.0  ;;  %v1900_v55 = vpop.eup %1899 }
 0x431   : > { %1099 = vadd.xlane.f32.xlu0 %v1098_v53  ;;  %v1208_v56 = vsel %vm864_vm8, %v1900_v55, 0.0 }
 0x434   : > { %v1228_v54 = vpop.permute.xlu2 %1227 }
 0x435   : > { %1240 = vmatpush.bf16.msrb.mxu3 %v1228_v54 }
 0x439   : > { %1209 = vadd.xlane.f32.xlu0 %v1208_v56 }
 0x43c   : > { %v1226_v58 = vpop.permute.xlu2 %1225  ;;  %v987_v60 = vpop.permute.xlu1 %986 }
 0x43d   : > { %1002 = vmatpush.bf16.msrb.mxu0 %v987_v60  ;;  %1241 = vmatpush.bf16.msrb.mxu3 %v1226_v58 }
 0x440   : > { %1684 = vmatmul.msk.bf16.vlgmr.msrb.gmra.mxu0 %vm864_vm8, %v983_v62 }
 0x442   : > { %1115 = vrot.lane.b32.xlu1 %v2379_v32, %s2049_s28 }
 0x44d   : > { %1117 = vrot.lane.b32.xlu0 %v2377_v30, %s2049_s28 }
 0x49c   : > { %v1207_v63 = vpop.xlane.xlu1 %1206 }
 0x49d   : > { %1901 = vrcp.f32 %v1207_v63 }
 0x4a3   : > { %v1902_v2 = vpop.eup %1901 }
 0x4a4   : > { %v1213_v3 = vmul.f32 %v1902_v2, %v1896_v46  ;;  %v1100_v4 = vpop.xlane.xlu0 %1099 }
 0x4a5   : > { %1903 = vrcp.f32 %v1100_v4 }
 0x4a6   : > { %v1215_v7 = vpack.c.bf16 %v1213_v3, %v1213_v3 }
 0x4a8   : > { %1693 = vst.msk [vmem:[%s2394_s10 + $0x18] sm:$0xf] %vm889_vm12, %v1215_v7  ;;  %v1222_v14 = vunpack.c.l.b16 %v1215_v7 }
 0x4ab   : > { %v1904_v8 = vpop.eup %1903 }
 0x4ac   : > { %v1104_v32 = vmul.f32 %v1904_v8, %v1898_v52  ;;  %v1210_v9 = vpop.xlane.xlu0 %1209 }
 0x4ad   : > { %1905 = vrcp.f32 %v1210_v9 }
 0x4ae   : > { %v1106_v30 = vpack.c.bf16 %v1104_v32, %v1104_v32 }
 0x4b0   : > { %1689 = vst.msk [vmem:[%s2394_s10 + $0x14] sm:$0xf] %vm889_vm12, %v1106_v30  ;;  %v1113_v20 = vunpack.c.l.b16 %v1106_v30 }
 0x4b2   : > { %v1114_v24 = vpack.c.b16 %v1113_v20, %v1112_v21 }
 0x4b3   : > { %v1906_v10 = vpop.eup %1905 }
 0x4b4   : > { %v1214_v12 = vmul.f32 %v1906_v10, %v1900_v55  ;;  %v1116_v22 = vpop.permute.xlu1 %1115 }
 0x4b6   : > { %v1216_v13 = vpack.c.bf16 %v1214_v12, %v1214_v12 }
 0x4b8   : > { %1694 = vst.msk [vmem:[%s2394_s10 + $0x1c] sm:$0xf] %vm889_vm12, %v1216_v13  ;;  %v1223_v15 = vunpack.c.l.b16 %v1216_v13 }
 0x4ba   : > { %v1224_v16 = vpack.c.b16 %v1223_v15, %v1222_v14 }
 0x4bc   : > { %1695 = vmatmul.msk.bf16.vlgmr.msrb.gmra.mxu3 %vm864_vm8, %v1224_v16 }
 0x4bd   : > { %v1004_v18 = vpop.f32.mrf.mxu0 }
 0x4bf   : > { %v1118_v19 = vpop.permute.xlu0 %1117 }
 0x4c0   : > { %1130 = vmatpush.bf16.msra.mxu0 %v1118_v19 }
 0x4c4   : > { %1131 = vmatpush.bf16.msra.mxu0 %v1116_v22 }
 0x4c5   : > { %v1006_v23 = vpop.f32.mrf.mxu0 }
 0x4c6   : > { %v1009_v25 = vpack.c.bf16 %v1006_v23, %v1004_v18 }
 0x4c7   : > { %1690 = vmatmul.msk.bf16.vlgmr.msra.gmra.mxu0 %vm864_vm8, %v1114_v24 }
 0x4c8   : > { %1685 = vmatmul.msk.bf16.vlgmr.msrb.gmra.mxu1 %vm838_vm1, %v1009_v25  ;;  %1263 = vmatpush.bf16.msrb.mxu0 %v1254_v27 }
 0x53f   : > { %v1243_v59 = vpop.f32.mrf.mxu3 }
 0x544   : > { %v1133_v0 = vpop.f32.mrf.mxu0 }
 0x545   : > { %v1027_v34 = vpop.f32.mrf.mxu1 }
 0x546   : > { %v1048_v36 = vadd.f32 %v2421_v11, %v1027_v34 }
 0x547   : > { %v1245_v1 = vpop.f32.mrf.mxu3 }
 0x548   : > { %v1248_v29 = vpack.c.bf16 %v1245_v1, %v1243_v59 }
 0x54a   : > { %1696 = vmatmul.msk.bf16.vlgmr.msrb.gmra.mxu0 %vm838_vm1, %v1248_v29 }
 0x54c   : > { %v1135_v31 = vpop.f32.mrf.mxu0 }
 0x54d   : > { %v1138_v33 = vpack.c.bf16 %v1135_v31, %v1133_v0  ;;  %v1029_v35 = vpop.f32.mrf.mxu1 }
 0x54e   : > { %v1050_v42 = vadd.f32 %v2424_v17, %v1029_v35 }
 0x54f   : > { %1691 = vmatmul.msk.bf16.vlgmr.msra.gmra.mxu1 %vm838_vm1, %v1138_v33 }
 0x5c7   : > { %v1265_v37 = vpop.f32.mrf.mxu0 }
 0x5cc   : > { %v1155_v39 = vpop.f32.mrf.mxu1 }
 0x5cd   : > { %v1160_v40 = vadd.f32 %v1155_v39, %v1048_v36 }
 0x5cf   : > { %v1270_v41 = vadd.f32 %v1265_v37, %v1160_v40  ;;  %v1267_v45 = vpop.f32.mrf.mxu0 }
 0x5d3   : > { %1275 = sbr.rel (%p1697_p9) target bundleno = 1501 (0x5dd), region = 64 }
 0x5d4   : > { %v1157_v43 = vpop.f32.mrf.mxu1 }
 0x5d5   : > { %v1161_v44 = vadd.f32 %v1157_v43, %v1050_v42 }
 0x5d7   : > { %v1271_v46 = vadd.f32 %v1267_v45, %v1161_v44 }
 0x5d8   : > { %v1907_v47 = vld [vmem:[%s2651_s8] ss:$0 sm:$0xff] }
 0x5d9   : > { %v1280_v48 = vadd.f32 %v1907_v47, %v1270_v41  ;;  %v1281_v11 = vadd.f32 %v1907_v47, %v1271_v46 }
 0x5db   : > { %1282 = vst.msk [vmem:[%s533_s6] sm:$0xff] %vm642_vm0, %v1280_v48 }
 0x5dc   : > { %1283 = vst.msk [vmem:[%s533_s6 + $0x8] sm:$0xff] %vm642_vm0, %v1281_v11 }
 0x5dd PF: > { %p1698_p10 = scmp.le.s32.totalorder %s2022_s23, 0 }
 0x5df   : > { %1287 = sbr.rel (%p1698_p10) target bundleno = 1513 (0x5e9), region = 68 }
 0x5e4   : > { %v1288_v17 = vld [vmem:[%s533_s6] sm:$0xff]  ;;  %v1289_v49 = vld [vmem:[%s533_s6 + $0x8] sm:$0xff] }
 0x5e5   : > { %v1290_v50 = vadd.f32 %v1288_v17, %v1270_v41  ;;  %v1291_v51 = vadd.f32 %v1289_v49, %v1271_v46 }
 0x5e7   : > { %1292 = vst.msk [vmem:[%s533_s6] sm:$0xff] %vm642_vm0, %v1290_v50 }
 0x5e8   : > { %1293 = vst.msk [vmem:[%s533_s6 + $0x8] sm:$0xff] %vm642_vm0, %v1291_v51 }
 0x5e9 PF: > { %s1702_s19 = sshll.u32 %s2030_s25, 2  ;;  %s1314_s9 = sshll.u32 %s533_s6, 4  ;;  %s1315_s9 = int_to_ptr.vmem [resolvable:$true] %s1314_s9 }
 0x5ea   : > { %s1311_s22 = sadd.s32 %s1702_s19, %s2261_s16  ;;  %s2653_s26 = sld [smem:[#allocation30_spill]] }
 0x5eb   : > { %s1703_s27 = sshll.u32 %s1311_s22, 3  ;;  %s1295_s28 = scalar_lea.sflag [#allocation3], %s531_s15 }
 0x5f0   : > { %s2654_s30 = smov %s2653_s26  ;;  %s1313_s20 = scalar_lea.hbm %s2653_s26, %s1703_s27 }
 0x5f1   : > { %s1316_s24 = sshll.u32 %s1313_s20, 4  ;;  %s1928_s19 = scalar_lea.hbm %s2654_s30, 64  ;;  %s1317_s24 = int_to_ptr.hbm [resolvable:$true] %s1316_s24 }
 0x5f2   : > { %s1922_s14 = sshra.s32 %s1317_s24, 4  ;;  %s1923_s14 = int_to_ptr.hbm [resolvable:$true] %s1922_s14 }
 0x5f3   : > { %s1924_s8 = scalar_lea.hbm %s1923_s14, 16  ;;  %p1929_p3 = scmp.lt.s32.totalorder %s1923_s14, %s2654_s30 }
 0x5f4   : > { %p1925_p13 = scmp.ne.s32.totalorder %s1923_s14, %s1924_s8  ;;  %p1930_p2 = scmp.lt.s32.totalorder %s1928_s19, %s1924_s8 }
 0x5f6   : > { %p1926_p0 = pnand %p1925_p13, %p2210_p6  ;;  %p1931_p4 = por %p1930_p2, %p1929_p3 }
 0x5f8   : > { %p1927_p1 = pneg %p1926_p0 }
 0x5fa   : > { %p1932_p5 = pnand %p1931_p4, %p1927_p1 }
 0x5fc   : > { %1935 = shalt.err (!%p1932_p5)
}
 0x5fd   : > { %s2053_s15 = smov 128   ;;  %s2054_s27 = smov 8  }
 0x5fe   : > { %1736 = dma.vmem_to_hbm [thread:$0]  (%p2210_p6), %s1315_s9, 256, %s1317_s24, %s1295_s28, %s2053_s15, %s2053_s15, %s2054_s27  }
 0x5ff   : > { %s2655_s5 = sand.u32 1, %s2002_s18  }
 0x600   : > { %s1300_s17 = scalar_lea.sflag [#allocation5], %s2655_s5 }
 0x601   : > { %s1734_s0 = sshll.u32 %s2022_s23, 4  ;;  %s1707_s12 = sshll.u32 %s2030_s25, 5 }
 0x602   : > { %s1331_s26 = sadd.s32 %s1734_s0, %s2261_s16  ;;  %s1346_s20 = sshll.u32 %s2394_s10, 4  ;;  %s1347_s20 = int_to_ptr.vmem [resolvable:$true] %s1346_s20 }
 0x603   : > { %s1333_s14 = sadd.s32 %s1707_s12, %s1331_s26  ;;  %s2656_s28 = sld [smem:[#allocation31_spill]] }
 0x604   : > { %s1708_s11 = sshll.u32 %s1333_s14, 2  ;;  %s2055_s6 = smov 128  }
 0x605   : > { %1737 = sst [smem:[#allocation7]] (%p2236_p11), %s2055_s6  ;;  %s2056_s23 = smov 256  }
 0x606   : > { %1738 = sst [smem:[#allocation7 + $0x1]] (%p2236_p11), %s2056_s23  ;;  %s2057_s25 = smov 2  }
 0x607   : > { %1739 = sst [smem:[#allocation7 + $0x2]] (%p2236_p11), %s2057_s25  ;;  %s2058_s16 = smov 64  }
 0x608   : > { %1740 = sst [smem:[#allocation7 + $0x3]] (%p2236_p11), %s2058_s16  ;;  %s2059_s10 = smov 4  }
 0x609   : > { %s1335_s8 = scalar_lea.hbm %s2656_s28, %s1708_s11  ;;  %1741 = sst [smem:[#allocation7 + $0x4]] (%p2236_p11), %s2058_s16 }
 0x60a   : > { %s1348_s19 = sshll.u32 %s1335_s8, 4  ;;  %1742 = sst [smem:[#allocation7 + $0x5]] (%p2236_p11), %s2059_s10  ;;  %s1349_s19 = int_to_ptr.hbm [resolvable:$true] %s1348_s19 }
 0x60b   : > { %s2060_s22 = smov [#allocation6]   ;;  %s2061_s15 = smov 0  }
 0x60c   : > { %1743 = dma.general (%p2236_p11), %s1347_s20, 512, %s1349_s19, %s1300_s17, %s2060_s22, [#allocation7], %s2061_s15, 0  }
 0x60d PF: > { %s2657_s27 = sld [smem:[#allocation12_spill]]  ;;  %p1753_p6 = scmp.ge.s32.totalorder %s2046_s29, 2 }
 0x60f   : > { %p1747_p8 = pnand %p1753_p6, %p2223_p7 }
 0x611   : > { %p1748_p9 = pneg %p1747_p8 }
 0x613   : > { %s1376_s0 = sand.u32 1, %s2657_s27  }
 0x614   : > { %s1377_s12 = scalar_lea.sflag [#allocation3], %s1376_s0 }
 0x615   : > { %1989 = dma.done.wait (%p1748_p9), %s1377_s12, 256  }
 0x616   : > { %1991 = vsyncadd (%p1748_p9), %s1377_s12, 4294967040  ;;  %s2659_s26 = sld [smem:[#allocation10_spill]]  ;;  %p1750_p10 = pnand %p1753_p6, %p2242_p12 }
 0x618   : > { %p1751_p13 = pneg %p1750_p10 }
 0x61c   : > { %s1386_s11 = sand.u32 1, %s2659_s26  }
 0x61d   : > { %s1387_s13 = scalar_lea.sflag [#allocation5], %s1386_s11 }
 0x61e   : > { %1993 = dma.done.wait (%p1751_p13), %s1387_s13, 512  }
 0x61f   : > { %1995 = vsyncadd (%p1751_p13), %s1387_s13, 4294966784  ;;  %s28_s29 = sadd.s32 1, %s2046_s29   ;;  %s2662_s20 = sld [smem:[#allocation11_spill]] }
 0x620   : > { %p2542_p11 = scmp.ge.s32.totalorder %s28_s29, 10   ;;  %s2663_s19 = sld [smem:[#allocation24_spill]] }
 0x621   : > { %s2664_s9 = sld [smem:[#allocation13_spill]]  ;;  %s2673_s17 = smov %s2002_s18 }
 0x622   : > { %s2665_s22 = sld [smem:[#allocation23_spill]] }
 0x623   : > { %s2666_s23 = sld [smem:[#allocation14_spill]] }
 0x624   : > { %s2667_s24 = sld [smem:[#allocation15_spill]]  ;;  %27 = sbr.rel (!%p2542_p11) target bundleno = 18 (0x12), region = 154 }
 0x625   : > { %s2668_s25 = sld [smem:[#allocation16_spill]]  ;;  %s2674_s18 = smov %s2662_s20 }
 0x626   : > { %s2669_s26 = sld [smem:[#allocation17_spill]]  ;;  %s2675_s20 = smov %s2014_s21 }
 0x627   : > { %s2670_s27 = sld [smem:[#allocation19_spill]]  ;;  %s2676_s21 = smov %s2664_s9 }
 0x628   : > { %s2671_s28 = sld [smem:[#allocation21_spill]] }
 0x629   :  { %1393 = vsyncpa [#allocation3], 1 }
 0x62a   :  { %1395 = vsyncpa [#allocation3 + $0x1], 1 }
 0x62b   :  { %1396 = vsyncpa [#allocation5], 1 }
 0x62c   :  { %1398 = vsyncpa [#allocation5 + $0x1], 1 }

</bundles_post_ra>
